<compile_context>
chip_gen: v7x
topology: tpu7x:2x2x1
jax: 0.10.0
libtpu: 0.0.40
codegen_flags: <defaults>
</compile_context>

<pallas_src>
import jax
import jax.numpy as jnp
from jax import lax
from jax.experimental import pallas as pl
from jax.experimental.pallas import tpu as pltpu

# ----------------------------- config (small, deterministic) -----------------------------
VOCAB = 128
MAX_POS = 16
HIDDEN = 32          # bert.config.hidden_size
NUM_HEADS = 4
HEAD_DIM = HIDDEN // NUM_HEADS
INTERMEDIATE = 128   # 4 * hidden
NUM_LAYERS = 2
LSTM_HIDDEN = 16     # lstm_hidden_size
NUM_LABELS = 4
BATCH = 2
SEQ = 8
LN_EPS = 1e-12

# One grid step processes the whole batch (best for single-TC v5e/v6e).
# On v7x, set GRID_STEPS = 2 (one step per TensorCore, rows packed per core).
GRID_STEPS = 1
assert BATCH % GRID_STEPS == 0
RB = BATCH // GRID_STEPS          # batch rows packed per grid step
RS = RB * SEQ                     # activation rows per step
NCOLS = NUM_HEADS * RS            # packed attention-score columns (head, batch, key)
GW = 8 * LSTM_HIDDEN              # BiLSTM gate width = 128 lanes
OUT_LANES = 128                   # lane-dense output block


# ----------------------------- slab layouts (shared by packer and kernel) -----------------------------
def _wslab_layout():
    layout = []
    for l in range(NUM_LAYERS):
        layout += [(f"wqkv{l}", HIDDEN, 3 * HIDDEN), (f"wo{l}", HIDDEN, HIDDEN),
                   (f"w1{l}", HIDDEN, INTERMEDIATE), (f"w2{l}", INTERMEDIATE, HIDDEN)]
    layout += [("wih", HIDDEN, GW), ("whh", 2 * LSTM_HIDDEN, GW),
               ("cls_w", 2 * LSTM_HIDDEN, NUM_LABELS),
               ("hmask", NCOLS, HIDDEN), ("blk", NCOLS, NCOLS)]
    return layout


W_LAYOUT = _wslab_layout()
W_OFF = {}
_off = 0
for _name, _r, _c in W_LAYOUT:
    W_OFF[_name] = (_off, _r, _c)
    _off += _r
W_ROWS = _off                     # 672


def _vslab_layout():
    layout = [("emb_ln_g", HIDDEN), ("emb_ln_b", HIDDEN)]
    for l in range(NUM_LAYERS):
        layout += [(f"bqkv{l}", 3 * HIDDEN), (f"bo{l}", HIDDEN),
                   (f"ln1_g{l}", HIDDEN), (f"ln1_b{l}", HIDDEN),
                   (f"b1{l}", INTERMEDIATE), (f"b2{l}", HIDDEN),
                   (f"ln2_g{l}", HIDDEN), (f"ln2_b{l}", HIDDEN)]
    layout += [("lstm_b", GW), ("cls_b", NUM_LABELS),
               ("gate_pre", GW), ("gate_post_s", GW), ("gate_post_b", GW),
               ("fwd_mask", GW)]
    return layout


V_LAYOUT = _vslab_layout()
V_OFF = {name: (i, width) for i, (name, width) in enumerate(V_LAYOUT)}
V_ROWS = len(V_LAYOUT)            # 24


# ----------------------------- in-kernel helpers -----------------------------
def _layer_norm(h, g, b):
    mu = jnp.mean(h, axis=-1, keepdims=True)
    d = h - mu
    var = jnp.mean(d * d, axis=-1, keepdims=True)
    return d * lax.rsqrt(var + LN_EPS) * g + b


# ----------------------------- the fused kernel -----------------------------
def _fused_kernel(emb_ref, bias_ref, w_ref, v_ref, o_ref):
    """One grid step == RB sublane-packed batch rows (whole batch with GRID_STEPS=1).

    emb LN -> NUM_LAYERS transformer layers -> combined fwd/bwd LSTM recurrence
    -> classifier + clamp(min=0) + softmax.
    """
    f32 = jnp.float32
    bf16 = jnp.bfloat16
    S, H, nH, dh, L = SEQ, HIDDEN, NUM_HEADS, HEAD_DIM, LSTM_HIDDEN
    scale = 1.0 / (dh ** 0.5)

    def W(name):                                  # bf16 weight-slab slice
        r0, r, c = W_OFF[name]
        return w_ref[r0:r0 + r, 0:c]

    def V(name):                                  # f32 vector-slab row
        r0, c = V_OFF[name]
        return v_ref[r0:r0 + 1, 0:c]

    hmask = W("hmask")                            # (NCOLS, H)   head block-diag mask (bf16)
    blk = W("blk")                                # (NCOLS, NCOLS) per-(batch,head) sum mask (bf16)
    bias_t = bias_ref[0]                          # (RS, NCOLS)  additive key/batch mask (f32)

    # --- embeddings LayerNorm ---
    x = _layer_norm(emb_ref[0], V("emb_ln_g"), V("emb_ln_b"))        # (RS, H) f32

    # --- BERT encoder layers (fully unrolled; everything stays in VMEM/vregs) ---
    for l in range(NUM_LAYERS):
        x_bf = x.astype(bf16)
        # fused QKV projection: one (RS, H) x (H, 3H) bf16 matmul, f32 accumulate
        qkv = jnp.dot(x_bf, W(f"wqkv{l}"), preferred_element_type=f32) + V(f"bqkv{l}")
        q = qkv[:, 0:H]
        k = qkv[:, H:2 * H]
        v = qkv[:, 2 * H:3 * H]

        # heads + batch packed along the key axis: block-diagonal K / V built with a
        # sublane concat + precomputed mask, so attention is 3 matmuls total.
        kbd = jnp.concatenate([k.astype(bf16)] * nH, axis=0) * hmask   # (NCOLS, H)
        vbd = jnp.concatenate([v.astype(bf16)] * nH, axis=0) * hmask   # (NCOLS, H)
        s = lax.dot_general(q.astype(bf16), kbd, (((1,), (1,)), ((), ())),
                            preferred_element_type=f32) * scale + bias_t   # (RS, NCOLS)

        # per-(batch,head) softmax; shift by the (finite) global row max, per-block sums
        # via the blk matmul.
        # TODO(synk): global-row max (not per-head) -- a head whose scores sit >~88 below
        # the row max underflows; the denom clamp below keeps the result finite.
        m = jnp.max(s, axis=-1, keepdims=True)
        p = jnp.exp(s - m)
        denom = jnp.dot(p.astype(bf16), blk, preferred_element_type=f32)
        denom = jnp.maximum(denom, 1e-20)
        pn = (p * pl.reciprocal(denom, approx=True)).astype(bf16)      # EUP reciprocal
        ctx = jnp.dot(pn, vbd, preferred_element_type=f32)             # (RS, H), head-major

        attn = jnp.dot(ctx.astype(bf16), W(f"wo{l}"), preferred_element_type=f32) + V(f"bo{l}")
        x = _layer_norm(x + attn, V(f"ln1_g{l}"), V(f"ln1_b{l}"))

        x_bf = x.astype(bf16)
        ff = jnp.dot(x_bf, W(f"w1{l}"), preferred_element_type=f32) + V(f"b1{l}")
        # TODO(synk): HF BERT default hidden_act is the exact erf GELU; tanh approx used here.
        ff = jax.nn.gelu(ff, approximate=True)
        ff = jnp.dot(ff.astype(bf16), W(f"w2{l}"), preferred_element_type=f32) + V(f"b2{l}")
        x = _layer_norm(x + ff, V(f"ln2_g{l}"), V(f"ln2_b{l}"))

    # --- BiLSTM: both directions, all RB batch rows advance together; gate width 128 lanes ---
    # Gate column layout: [i_f, i_b, f_f, f_b, g_f, g_b, o_f, o_b] (each width L).
    fm = V("fwd_mask")                            # 1.0 on forward-direction lanes
    one_m_fm = 1.0 - fm
    pre = V("gate_pre")                           # 0.5 on sigmoid lanes, 1.0 on g lanes
    post_s = V("gate_post_s")
    post_b = V("gate_post_b")

    xg = jnp.dot(x.astype(bf16), W("wih"), preferred_element_type=f32) + V("lstm_b")   # (RS, 8L)

    # Direction select hoisted out of the serial recurrence: per step t, forward lanes
    # read x_t, backward lanes read x_{S-1-t}, gathered per batch row with static slices.
    gx = []
    for t in range(S):
        fwd = jnp.concatenate([xg[b * S + t: b * S + t + 1, :] for b in range(RB)], axis=0)
        bwd = jnp.concatenate([xg[b * S + (S - 1 - t): b * S + (S - 1 - t) + 1, :]
                               for b in range(RB)], axis=0)
        gx.append(fm * fwd + one_m_fm * bwd)      # (RB, 8L)

    whh = W("whh")                                # (2L, 8L) block-diag recurrent weights (bf16)
    h = jnp.zeros((RB, 2 * L), f32)               # [h_fwd | h_bwd]
    c = jnp.zeros((RB, 2 * L), f32)
    for t in range(S):
        gates = gx[t] + jnp.dot(h.astype(bf16), whh, preferred_element_type=f32)   # (RB, 8L)
        # single EUP push for all 4 gates: sigmoid(x) = 0.5*tanh(x/2) + 0.5
        act = jnp.tanh(gates * pre) * post_s + post_b
        i_g = act[:, 0 * 2 * L:1 * 2 * L]
        f_g = act[:, 1 * 2 * L:2 * 2 * L]
        g_g = act[:, 2 * 2 * L:3 * 2 * L]
        o_g = act[:, 3 * 2 * L:4 * 2 * L]
        c = f_g * c + i_g * g_g
        h = o_g * jnp.tanh(c)
    # h == [fwd final | bwd final] == torch.cat((h_n[-2], h_n[-1]), dim=1)

    # nn.Dropout(0.1) is identity at inference time.
    # TODO(synk): training-mode dropout (p=0.1) not implemented.

    # --- classifier + clamp(min=0) + softmax (exact division for the final probs) ---
    logits = jnp.dot(h.astype(bf16), W("cls_w"), preferred_element_type=f32) + V("cls_b")
    logits = jnp.maximum(logits, 0.0)
    lm = jnp.max(logits, axis=-1, keepdims=True)
    e = jnp.exp(logits - lm)
    probs = e / jnp.sum(e, axis=-1, keepdims=True)                    # (RB, NUM_LABELS)
    # lane-dense store: one (RB, 128) write; wrapper slices the first NUM_LABELS lanes.
    o_ref[0] = jnp.concatenate(
        [probs, jnp.zeros((RB, OUT_LANES - NUM_LABELS), f32)], axis=1)


# ----------------------------- host-side constant / bias builders -----------------------------
def _pad_cols(a, width=128):
    return jnp.pad(a, ((0, 0), (0, width - a.shape[1])))


def _build_attn_bias(attention_mask):
    """(GRID_STEPS, RS, NCOLS) additive bias: 0 for same-batch unmasked keys, else -1e9.

    Packed column index = h * RS + b_local * S + key_pos.
    """
    am = attention_mask.astype(jnp.float32)                      # (B, S)
    rows_b = jnp.arange(RS) // SEQ                               # local batch of the query row
    cols = jnp.arange(NCOLS)
    cols_b = (cols % RS) // SEQ                                  # local batch of the key column
    cols_ks = cols % SEQ                                         # key position of the column
    same_b = rows_b[:, None] == cols_b[None, :]                  # (RS, NCOLS)
    biases = []
    for g in range(GRID_STEPS):
        key_ok = am[g * RB + cols_b, cols_ks] > 0.5              # (NCOLS,)
        ok = same_b & key_ok[None, :]
        biases.append(jnp.where(ok, 0.0, -1e9).astype(jnp.float32))
    return jnp.stack(biases, axis=0)


def pack_params(params):
    """Pack weights into one bf16 (W_ROWS,128) slab and vectors into one f32 (V_ROWS,128) slab."""
    # attention packing masks (batch-AND-head block diagonal), precomputed on the host
    rr = jnp.arange(NCOLS)[:, None]
    hmask = (rr // RS == (jnp.arange(HIDDEN)[None, :] // HEAD_DIM)).astype(jnp.float32)
    blk = (rr // SEQ == (jnp.arange(NCOLS)[None, :] // SEQ)).astype(jnp.float32)

    wparts = []
    for lp in params["layers"]:
        wparts += [_pad_cols(lp["wqkv"]), _pad_cols(lp["wo"]),
                   _pad_cols(lp["w1"]), _pad_cols(lp["w2"])]
    wparts += [_pad_cols(params["lstm"]["wih"]), _pad_cols(params["lstm"]["whh"]),
               _pad_cols(params["cls_w"]), _pad_cols(hmask), _pad_cols(blk)]
    wslab = jnp.concatenate(wparts, axis=0).astype(jnp.bfloat16)
    assert wslab.shape == (W_ROWS, 128)

    # LSTM gate constants: single-tanh gate trick + forward-lane select mask
    L = LSTM_HIDDEN
    lane = jnp.arange(GW)
    g_lane = (lane // (2 * L)) == 2                              # lanes of the g (tanh) gate
    gate_pre = jnp.where(g_lane, 1.0, 0.5)[None, :].astype(jnp.float32)
    gate_post_s = gate_pre
    gate_post_b = jnp.where(g_lane, 0.0, 0.5)[None, :].astype(jnp.float32)
    fwd_mask = (((lane // L) % 2) == 0).astype(jnp.float32)[None, :]

    vrows = {
        "emb_ln_g": params["emb_ln_g"], "emb_ln_b": params["emb_ln_b"],
        "lstm_b": params["lstm"]["b"], "cls_b": params["cls_b"],
        "gate_pre": gate_pre, "gate_post_s": gate_post_s, "gate_post_b": gate_post_b,
        "fwd_mask": fwd_mask,
    }
    for l, lp in enumerate(params["layers"]):
        for nm in ("bqkv", "bo", "ln1_g", "ln1_b", "b1", "b2", "ln2_g", "ln2_b"):
            vrows[f"{nm}{l}"] = lp[nm]

    vparts = []
    for name, width in V_LAYOUT:
        row = vrows[name].astype(jnp.float32)
        assert row.shape == (1, width), (name, row.shape, width)
        vparts.append(_pad_cols(row))
    vslab = jnp.concatenate(vparts, axis=0)
    assert vslab.shape == (V_ROWS, 128)

    return {"word_emb": params["word_emb"], "pos_emb": params["pos_emb"],
            "type_emb": params["type_emb"], "wslab": wslab, "vslab": vslab}


# ----------------------------- wrapper -----------------------------
def bert_bilstm_forward(packed, input_ids, attention_mask):
    B, S = input_ids.shape

    # BERT embeddings lookup (gather glue; everything else runs inside the Pallas kernel)
    tok = jnp.take(packed["word_emb"], input_ids, axis=0)                      # (B, S, H)
    emb = tok + packed["pos_emb"][:S][None, :, :] + packed["type_emb"][0][None, None, :]
    emb = emb.astype(jnp.float32).reshape(GRID_STEPS, RS, HIDDEN)

    bias = _build_attn_bias(attention_mask)                                    # (G, RS, NCOLS)

    out = pl.pallas_call(
        _fused_kernel,
        out_shape=jax.ShapeDtypeStruct((GRID_STEPS, RB, OUT_LANES), jnp.float32),
        grid=(GRID_STEPS,),
        in_specs=[
            pl.BlockSpec((1, RS, HIDDEN), lambda i: (i, 0, 0)),
            pl.BlockSpec((1, RS, NCOLS), lambda i: (i, 0, 0)),
            pl.BlockSpec((W_ROWS, 128), lambda i: (0, 0)),
            pl.BlockSpec((V_ROWS, 128), lambda i: (0, 0)),
        ],
        out_specs=pl.BlockSpec((1, RB, OUT_LANES), lambda i: (i, 0, 0)),
        compiler_params=pltpu.CompilerParams(dimension_semantics=("parallel",)),
    )(emb, bias, packed["wslab"], packed["vslab"])

    return out.reshape(B, OUT_LANES)[:, :NUM_LABELS]


# ----------------------------- deterministic parameter init -----------------------------
def init_params(key):
    def nrm(k, shape, std=0.02):
        return (std * jax.random.normal(k, shape)).astype(jnp.float32)

    ks = jax.random.split(key, 5 + NUM_LAYERS)
    kw, kp, kt, klstm, kcls = ks[0], ks[1], ks[2], ks[3], ks[4]
    layer_keys = ks[5:]

    params = {
        "word_emb": nrm(kw, (VOCAB, HIDDEN)),
        "pos_emb": nrm(kp, (MAX_POS, HIDDEN)),
        "type_emb": nrm(kt, (2, HIDDEN)),
        "emb_ln_g": jnp.ones((1, HIDDEN), jnp.float32),
        "emb_ln_b": jnp.zeros((1, HIDDEN), jnp.float32),
        "layers": [],
    }
    for lk in layer_keys:
        sk = jax.random.split(lk, 6)
        wq, wk, wv = (nrm(sk[0], (HIDDEN, HIDDEN)),
                      nrm(sk[1], (HIDDEN, HIDDEN)),
                      nrm(sk[2], (HIDDEN, HIDDEN)))
        params["layers"].append({
            "wqkv": jnp.concatenate([wq, wk, wv], axis=1),         # merged Q/K/V projection
            "bqkv": jnp.zeros((1, 3 * HIDDEN), jnp.float32),
            "wo": nrm(sk[3], (HIDDEN, HIDDEN)), "bo": jnp.zeros((1, HIDDEN), jnp.float32),
            "ln1_g": jnp.ones((1, HIDDEN), jnp.float32), "ln1_b": jnp.zeros((1, HIDDEN), jnp.float32),
            "w1": nrm(sk[4], (HIDDEN, INTERMEDIATE)), "b1": jnp.zeros((1, INTERMEDIATE), jnp.float32),
            "w2": nrm(sk[5], (INTERMEDIATE, HIDDEN)), "b2": jnp.zeros((1, HIDDEN), jnp.float32),
            "ln2_g": jnp.ones((1, HIDDEN), jnp.float32), "ln2_b": jnp.zeros((1, HIDDEN), jnp.float32),
        })

    # --- BiLSTM: per-direction weights (PyTorch layout, gate order i,f,g,o, pre-transposed),
    #     packed into the layouts the kernel consumes:
    #       wih (H, 8L)   columns [i_f,i_b,f_f,f_b,g_f,g_b,o_f,o_b]
    #       whh (2L, 8L)  block-diagonal: h_fwd rows feed fwd-gate cols, h_bwd rows feed bwd cols
    #       b   (1, 8L)   same column layout (b_ih + b_hh folded)
    L = LSTM_HIDDEN
    lk = jax.random.split(klstm, 6)
    std = 1.0 / (L ** 0.5)
    wih_f = nrm(lk[0], (HIDDEN, 4 * L), std)
    whh_f = nrm(lk[1], (L, 4 * L), std)
    b_f = nrm(lk[2], (1, 4 * L), std)
    wih_b = nrm(lk[3], (HIDDEN, 4 * L), std)
    whh_b = nrm(lk[4], (L, 4 * L), std)
    b_b = nrm(lk[5], (1, 4 * L), std)

    def interleave(wf, wb):
        parts = []
        for g in range(4):
            parts.append(wf[:, g * L:(g + 1) * L])
            parts.append(wb[:, g * L:(g + 1) * L])
        return jnp.concatenate(parts, axis=1)

    whh = jnp.zeros((2 * L, 8 * L), jnp.float32)
    for g in range(4):
        whh = whh.at[0:L, (2 * g) * L:(2 * g + 1) * L].set(whh_f[:, g * L:(g + 1) * L])
        whh = whh.at[L:2 * L, (2 * g + 1) * L:(2 * g + 2) * L].set(whh_b[:, g * L:(g + 1) * L])

    params["lstm"] = {"wih": interleave(wih_f, wih_b), "whh": whh, "b": interleave(b_f, b_b)}

    ck = jax.random.split(kcls, 2)
    params["cls_w"] = nrm(ck[0], (2 * L, NUM_LABELS), std)
    params["cls_b"] = jnp.zeros((1, NUM_LABELS), jnp.float32)
    return params


# ----------------------------- main -----------------------------
if __name__ == "__main__":
    key = jax.random.PRNGKey(0)
    pkey, ikey = jax.random.split(key)

    params = init_params(pkey)
    packed = pack_params(params)          # slab packing done once, outside jit
    input_ids = jax.random.randint(ikey, (BATCH, SEQ), 0, VOCAB, dtype=jnp.int32)
    attention_mask = jnp.ones((BATCH, SEQ), jnp.int32).at[1, SEQ - 2:].set(0)

    probs = jax.jit(bert_bilstm_forward)(packed, input_ids, attention_mask)
    probs = jax.block_until_ready(probs)

    assert probs.shape == (BATCH, NUM_LABELS)
    assert bool(jnp.all(jnp.isfinite(probs)))
    assert bool(jnp.allclose(jnp.sum(probs, axis=1), 1.0, atol=1e-5))
    print("KERNEL_OK")
</pallas_src>

<mosaic_0001>
module attributes {stable_mosaic.version = 11 : i64} {
  func.func @_fused_kernel(%arg0: i32, %arg1: memref<1x16x32xf32, #tpu.memory_space<vmem>>, %arg2: memref<1x16x64xf32, #tpu.memory_space<vmem>>, %arg3: memref<672x128xbf16, #tpu.memory_space<vmem>>, %arg4: memref<24x128xf32, #tpu.memory_space<vmem>>, %arg5: memref<1x2x128xf32, #tpu.memory_space<vmem>>) attributes {dimension_semantics = [#tpu.dimension_semantics<parallel>], iteration_bounds = array<i64: 1>, scalar_prefetch = 0 : i64, scratch_operands = 0 : i64, tpu.core_type = #tpu.core_type<tc>, window_params = [{transform_indices = @transform_0, window_bounds = array<i64: 1, 16, 32>}, {transform_indices = @transform_1, window_bounds = array<i64: 1, 16, 64>}, {pipeline_mode = #tpu.pipeline_mode<synchronous>, transform_indices = @transform_2, window_bounds = array<i64: 672, 128>}, {pipeline_mode = #tpu.pipeline_mode<synchronous>, transform_indices = @transform_3, window_bounds = array<i64: 24, 128>}, {transform_indices = @transform_4, window_bounds = array<i64: 1, 2, 128>}]} {
    %c544 = arith.constant 544 : index
    %c0 = arith.constant 0 : index
    %0 = vector.load %arg3[%c544, %c0] : memref<672x128xbf16, #tpu.memory_space<vmem>>, vector<64x32xbf16>
    %c608 = arith.constant 608 : index
    %c0_0 = arith.constant 0 : index
    %1 = vector.load %arg3[%c608, %c0_0] : memref<672x128xbf16, #tpu.memory_space<vmem>>, vector<64x64xbf16>
    %c0_1 = arith.constant 0 : index
    %c0_2 = arith.constant 0 : index
    %c0_3 = arith.constant 0 : index
    %2 = vector.load %arg2[%c0_1, %c0_2, %c0_3] : memref<1x16x64xf32, #tpu.memory_space<vmem>>, vector<1x16x64xf32>
    %3 = vector.shape_cast %2 : vector<1x16x64xf32> to vector<16x64xf32>
    %c0_4 = arith.constant 0 : index
    %c0_5 = arith.constant 0 : index
    %c0_6 = arith.constant 0 : index
    %4 = vector.load %arg1[%c0_4, %c0_5, %c0_6] : memref<1x16x32xf32, #tpu.memory_space<vmem>>, vector<1x16x32xf32>
    %5 = vector.shape_cast %4 : vector<1x16x32xf32> to vector<16x32xf32>
    %c0_7 = arith.constant 0 : index
    %c0_8 = arith.constant 0 : index
    %6 = vector.load %arg4[%c0_7, %c0_8] : memref<24x128xf32, #tpu.memory_space<vmem>>, vector<1x32xf32>
    %c1 = arith.constant 1 : index
    %c0_9 = arith.constant 0 : index
    %7 = vector.load %arg4[%c1, %c0_9] : memref<24x128xf32, #tpu.memory_space<vmem>>, vector<1x32xf32>
    %cst = arith.constant dense<0.000000e+00> : vector<16xf32>
    %8 = vector.multi_reduction <add>, %5, %cst [1] : vector<16x32xf32> to vector<16xf32>
    %9 = vector.shape_cast %8 : vector<16xf32> to vector<16x1xf32>
    %cst_10 = arith.constant 3.200000e+01 : f32
    %10 = vector.broadcast %cst_10 : f32 to vector<16x1xf32>
    %11 = arith.divf %9, %10 : vector<16x1xf32>
    %12 = vector.broadcast %11 : vector<16x1xf32> to vector<16x32xf32>
    %13 = arith.subf %5, %12 : vector<16x32xf32>
    %14 = arith.mulf %13, %13 : vector<16x32xf32>
    %cst_11 = arith.constant dense<0.000000e+00> : vector<16xf32>
    %15 = vector.multi_reduction <add>, %14, %cst_11 [1] : vector<16x32xf32> to vector<16xf32>
    %16 = vector.shape_cast %15 : vector<16xf32> to vector<16x1xf32>
    %cst_12 = arith.constant 3.200000e+01 : f32
    %17 = vector.broadcast %cst_12 : f32 to vector<16x1xf32>
    %18 = arith.divf %16, %17 : vector<16x1xf32>
    %cst_13 = arith.constant 9.99999996E-13 : f32
    %19 = vector.broadcast %cst_13 : f32 to vector<16x1xf32>
    %20 = arith.addf %18, %19 : vector<16x1xf32>
    %21 = math.rsqrt %20 : vector<16x1xf32>
    %22 = vector.broadcast %21 : vector<16x1xf32> to vector<16x32xf32>
    %23 = arith.mulf %13, %22 : vector<16x32xf32>
    %24 = vector.broadcast %6 : vector<1x32xf32> to vector<16x32xf32>
    %25 = arith.mulf %23, %24 : vector<16x32xf32>
    %26 = vector.broadcast %7 : vector<1x32xf32> to vector<16x32xf32>
    %27 = arith.addf %25, %26 : vector<16x32xf32>
    %28 = arith.truncf %27 : vector<16x32xf32> to vector<16x32xbf16>
    %c0_14 = arith.constant 0 : index
    %c0_15 = arith.constant 0 : index
    %29 = vector.load %arg3[%c0_14, %c0_15] : memref<672x128xbf16, #tpu.memory_space<vmem>>, vector<32x96xbf16>
    %cst_16 = arith.constant dense<0.000000e+00> : vector<16x96xf32>
    %30 = tpu.matmul %28, %29, %cst_16 {dimension_numbers = #tpu.dot_dimension_numbers<[1], [0], [0], [1], [0, 0, 1, 1], [], []>} : vector<16x32xbf16>, vector<32x96xbf16>, vector<16x96xf32> -> vector<16x96xf32>
    %c2 = arith.constant 2 : index
    %c0_17 = arith.constant 0 : index
    %31 = vector.load %arg4[%c2, %c0_17] : memref<24x128xf32, #tpu.memory_space<vmem>>, vector<1x96xf32>
    %32 = vector.broadcast %31 : vector<1x96xf32> to vector<16x96xf32>
    %33 = arith.addf %30, %32 : vector<16x96xf32>
    %34 = vector.extract_strided_slice %33 {offsets = [0, 0], sizes = [16, 32], strides = [1, 1]} : vector<16x96xf32> to vector<16x32xf32>
    %35 = vector.extract_strided_slice %33 {offsets = [0, 32], sizes = [16, 32], strides = [1, 1]} : vector<16x96xf32> to vector<16x32xf32>
    %36 = vector.extract_strided_slice %33 {offsets = [0, 64], sizes = [16, 32], strides = [1, 1]} : vector<16x96xf32> to vector<16x32xf32>
    %37 = arith.truncf %35 : vector<16x32xf32> to vector<16x32xbf16>
    %38 = tpu.concatenate %37, %37, %37, %37 in 0 : vector<16x32xbf16>, vector<16x32xbf16>, vector<16x32xbf16>, vector<16x32xbf16> -> vector<64x32xbf16>
    %39 = arith.mulf %38, %0 : vector<64x32xbf16>
    %40 = arith.truncf %36 : vector<16x32xf32> to vector<16x32xbf16>
    %41 = tpu.concatenate %40, %40, %40, %40 in 0 : vector<16x32xbf16>, vector<16x32xbf16>, vector<16x32xbf16>, vector<16x32xbf16> -> vector<64x32xbf16>
    %42 = arith.mulf %41, %0 : vector<64x32xbf16>
    %43 = arith.truncf %34 : vector<16x32xf32> to vector<16x32xbf16>
    %cst_18 = arith.constant dense<0.000000e+00> : vector<16x64xf32>
    %44 = tpu.matmul %43, %39, %cst_18 {dimension_numbers = #tpu.dot_dimension_numbers<[1], [1], [0], [0], [0, 0, 1, 0], [], []>} : vector<16x32xbf16>, vector<64x32xbf16>, vector<16x64xf32> -> vector<16x64xf32>
    %cst_19 = arith.constant 0.353553385 : f32
    %45 = vector.broadcast %cst_19 : f32 to vector<16x64xf32>
    %46 = arith.mulf %44, %45 : vector<16x64xf32>
    %47 = arith.addf %46, %3 : vector<16x64xf32>
    %cst_20 = arith.constant dense<0xFF800000> : vector<16xf32>
    %48 = vector.multi_reduction <maximumf>, %47, %cst_20 [1] : vector<16x64xf32> to vector<16xf32>
    %49 = vector.shape_cast %48 : vector<16xf32> to vector<16x1xf32>
    %50 = vector.broadcast %49 : vector<16x1xf32> to vector<16x64xf32>
    %51 = arith.subf %47, %50 : vector<16x64xf32>
    %52 = math.exp %51 : vector<16x64xf32>
    %53 = arith.truncf %52 : vector<16x64xf32> to vector<16x64xbf16>
    %cst_21 = arith.constant dense<0.000000e+00> : vector<16x64xf32>
    %54 = tpu.matmul %53, %1, %cst_21 {dimension_numbers = #tpu.dot_dimension_numbers<[1], [0], [0], [1], [0, 0, 1, 1], [], []>} : vector<16x64xbf16>, vector<64x64xbf16>, vector<16x64xf32> -> vector<16x64xf32>
    %cst_22 = arith.constant 9.99999968E-21 : f32
    %55 = vector.broadcast %cst_22 : f32 to vector<16x64xf32>
    %56 = arith.maximumf %54, %55 : vector<16x64xf32>
    %57 = tpu.reciprocal %56 {approx = true} : vector<16x64xf32> -> vector<16x64xf32>
    %58 = arith.mulf %52, %57 : vector<16x64xf32>
    %59 = arith.truncf %58 : vector<16x64xf32> to vector<16x64xbf16>
    %cst_23 = arith.constant dense<0.000000e+00> : vector<16x32xf32>
    %60 = tpu.matmul %59, %42, %cst_23 {dimension_numbers = #tpu.dot_dimension_numbers<[1], [0], [0], [1], [0, 0, 1, 1], [], []>} : vector<16x64xbf16>, vector<64x32xbf16>, vector<16x32xf32> -> vector<16x32xf32>
    %61 = arith.truncf %60 : vector<16x32xf32> to vector<16x32xbf16>
    %c32 = arith.constant 32 : index
    %c0_24 = arith.constant 0 : index
    %62 = vector.load %arg3[%c32, %c0_24] : memref<672x128xbf16, #tpu.memory_space<vmem>>, vector<32x32xbf16>
    %cst_25 = arith.constant dense<0.000000e+00> : vector<16x32xf32>
    %63 = tpu.matmul %61, %62, %cst_25 {dimension_numbers = #tpu.dot_dimension_numbers<[1], [0], [0], [1], [0, 0, 1, 1], [], []>} : vector<16x32xbf16>, vector<32x32xbf16>, vector<16x32xf32> -> vector<16x32xf32>
    %c3 = arith.constant 3 : index
    %c0_26 = arith.constant 0 : index
    %64 = vector.load %arg4[%c3, %c0_26] : memref<24x128xf32, #tpu.memory_space<vmem>>, vector<1x32xf32>
    %65 = vector.broadcast %64 : vector<1x32xf32> to vector<16x32xf32>
    %66 = arith.addf %63, %65 : vector<16x32xf32>
    %67 = arith.addf %27, %66 : vector<16x32xf32>
    %c4 = arith.constant 4 : index
    %c0_27 = arith.constant 0 : index
    %68 = vector.load %arg4[%c4, %c0_27] : memref<24x128xf32, #tpu.memory_space<vmem>>, vector<1x32xf32>
    %c5 = arith.constant 5 : index
    %c0_28 = arith.constant 0 : index
    %69 = vector.load %arg4[%c5, %c0_28] : memref<24x128xf32, #tpu.memory_space<vmem>>, vector<1x32xf32>
    %cst_29 = arith.constant dense<0.000000e+00> : vector<16xf32>
    %70 = vector.multi_reduction <add>, %67, %cst_29 [1] : vector<16x32xf32> to vector<16xf32>
    %71 = vector.shape_cast %70 : vector<16xf32> to vector<16x1xf32>
    %cst_30 = arith.constant 3.200000e+01 : f32
    %72 = vector.broadcast %cst_30 : f32 to vector<16x1xf32>
    %73 = arith.divf %71, %72 : vector<16x1xf32>
    %74 = vector.broadcast %73 : vector<16x1xf32> to vector<16x32xf32>
    %75 = arith.subf %67, %74 : vector<16x32xf32>
    %76 = arith.mulf %75, %75 : vector<16x32xf32>
    %cst_31 = arith.constant dense<0.000000e+00> : vector<16xf32>
    %77 = vector.multi_reduction <add>, %76, %cst_31 [1] : vector<16x32xf32> to vector<16xf32>
    %78 = vector.shape_cast %77 : vector<16xf32> to vector<16x1xf32>
    %cst_32 = arith.constant 3.200000e+01 : f32
    %79 = vector.broadcast %cst_32 : f32 to vector<16x1xf32>
    %80 = arith.divf %78, %79 : vector<16x1xf32>
    %cst_33 = arith.constant 9.99999996E-13 : f32
    %81 = vector.broadcast %cst_33 : f32 to vector<16x1xf32>
    %82 = arith.addf %80, %81 : vector<16x1xf32>
    %83 = math.rsqrt %82 : vector<16x1xf32>
    %84 = vector.broadcast %83 : vector<16x1xf32> to vector<16x32xf32>
    %85 = arith.mulf %75, %84 : vector<16x32xf32>
    %86 = vector.broadcast %68 : vector<1x32xf32> to vector<16x32xf32>
    %87 = arith.mulf %85, %86 : vector<16x32xf32>
    %88 = vector.broadcast %69 : vector<1x32xf32> to vector<16x32xf32>
    %89 = arith.addf %87, %88 : vector<16x32xf32>
    %90 = arith.truncf %89 : vector<16x32xf32> to vector<16x32xbf16>
    %c64 = arith.constant 64 : index
    %c0_34 = arith.constant 0 : index
    %91 = vector.load %arg3[%c64, %c0_34] : memref<672x128xbf16, #tpu.memory_space<vmem>>, vector<32x128xbf16>
    %cst_35 = arith.constant dense<0.000000e+00> : vector<16x128xf32>
    %92 = tpu.matmul %90, %91, %cst_35 {dimension_numbers = #tpu.dot_dimension_numbers<[1], [0], [0], [1], [0, 0, 1, 1], [], []>} : vector<16x32xbf16>, vector<32x128xbf16>, vector<16x128xf32> -> vector<16x128xf32>
    %c6 = arith.constant 6 : index
    %c0_36 = arith.constant 0 : index
    %93 = vector.load %arg4[%c6, %c0_36] : memref<24x128xf32, #tpu.memory_space<vmem>>, vector<1x128xf32>
    %94 = vector.broadcast %93 : vector<1x128xf32> to vector<16x128xf32>
    %95 = arith.addf %92, %94 : vector<16x128xf32>
    %96 = arith.mulf %95, %95 : vector<16x128xf32>
    %97 = arith.mulf %95, %96 : vector<16x128xf32>
    %cst_37 = arith.constant 4.471500e-02 : f32
    %98 = vector.broadcast %cst_37 : f32 to vector<16x128xf32>
    %99 = arith.mulf %98, %97 : vector<16x128xf32>
    %100 = arith.addf %95, %99 : vector<16x128xf32>
    %cst_38 = arith.constant 0.797884583 : f32
    %101 = vector.broadcast %cst_38 : f32 to vector<16x128xf32>
    %102 = arith.mulf %101, %100 : vector<16x128xf32>
    %103 = math.tanh %102 : vector<16x128xf32>
    %cst_39 = arith.constant 1.000000e+00 : f32
    %104 = vector.broadcast %cst_39 : f32 to vector<16x128xf32>
    %105 = arith.addf %104, %103 : vector<16x128xf32>
    %cst_40 = arith.constant 5.000000e-01 : f32
    %106 = vector.broadcast %cst_40 : f32 to vector<16x128xf32>
    %107 = arith.mulf %106, %105 : vector<16x128xf32>
    %108 = arith.mulf %95, %107 : vector<16x128xf32>
    %109 = arith.truncf %108 : vector<16x128xf32> to vector<16x128xbf16>
    %c96 = arith.constant 96 : index
    %c0_41 = arith.constant 0 : index
    %110 = vector.load %arg3[%c96, %c0_41] : memref<672x128xbf16, #tpu.memory_space<vmem>>, vector<128x32xbf16>
    %cst_42 = arith.constant dense<0.000000e+00> : vector<16x32xf32>
    %111 = tpu.matmul %109, %110, %cst_42 {dimension_numbers = #tpu.dot_dimension_numbers<[1], [0], [0], [1], [0, 0, 1, 1], [], []>} : vector<16x128xbf16>, vector<128x32xbf16>, vector<16x32xf32> -> vector<16x32xf32>
    %c7 = arith.constant 7 : index
    %c0_43 = arith.constant 0 : index
    %112 = vector.load %arg4[%c7, %c0_43] : memref<24x128xf32, #tpu.memory_space<vmem>>, vector<1x32xf32>
    %113 = vector.broadcast %112 : vector<1x32xf32> to vector<16x32xf32>
    %114 = arith.addf %111, %113 : vector<16x32xf32>
    %115 = arith.addf %89, %114 : vector<16x32xf32>
    %c8 = arith.constant 8 : index
    %c0_44 = arith.constant 0 : index
    %116 = vector.load %arg4[%c8, %c0_44] : memref<24x128xf32, #tpu.memory_space<vmem>>, vector<1x32xf32>
    %c9 = arith.constant 9 : index
    %c0_45 = arith.constant 0 : index
    %117 = vector.load %arg4[%c9, %c0_45] : memref<24x128xf32, #tpu.memory_space<vmem>>, vector<1x32xf32>
    %cst_46 = arith.constant dense<0.000000e+00> : vector<16xf32>
    %118 = vector.multi_reduction <add>, %115, %cst_46 [1] : vector<16x32xf32> to vector<16xf32>
    %119 = vector.shape_cast %118 : vector<16xf32> to vector<16x1xf32>
    %cst_47 = arith.constant 3.200000e+01 : f32
    %120 = vector.broadcast %cst_47 : f32 to vector<16x1xf32>
    %121 = arith.divf %119, %120 : vector<16x1xf32>
    %122 = vector.broadcast %121 : vector<16x1xf32> to vector<16x32xf32>
    %123 = arith.subf %115, %122 : vector<16x32xf32>
    %124 = arith.mulf %123, %123 : vector<16x32xf32>
    %cst_48 = arith.constant dense<0.000000e+00> : vector<16xf32>
    %125 = vector.multi_reduction <add>, %124, %cst_48 [1] : vector<16x32xf32> to vector<16xf32>
    %126 = vector.shape_cast %125 : vector<16xf32> to vector<16x1xf32>
    %cst_49 = arith.constant 3.200000e+01 : f32
    %127 = vector.broadcast %cst_49 : f32 to vector<16x1xf32>
    %128 = arith.divf %126, %127 : vector<16x1xf32>
    %cst_50 = arith.constant 9.99999996E-13 : f32
    %129 = vector.broadcast %cst_50 : f32 to vector<16x1xf32>
    %130 = arith.addf %128, %129 : vector<16x1xf32>
    %131 = math.rsqrt %130 : vector<16x1xf32>
    %132 = vector.broadcast %131 : vector<16x1xf32> to vector<16x32xf32>
    %133 = arith.mulf %123, %132 : vector<16x32xf32>
    %134 = vector.broadcast %116 : vector<1x32xf32> to vector<16x32xf32>
    %135 = arith.mulf %133, %134 : vector<16x32xf32>
    %136 = vector.broadcast %117 : vector<1x32xf32> to vector<16x32xf32>
    %137 = arith.addf %135, %136 : vector<16x32xf32>
    %138 = arith.truncf %137 : vector<16x32xf32> to vector<16x32xbf16>
    %c224 = arith.constant 224 : index
    %c0_51 = arith.constant 0 : index
    %139 = vector.load %arg3[%c224, %c0_51] : memref<672x128xbf16, #tpu.memory_space<vmem>>, vector<32x96xbf16>
    %cst_52 = arith.constant dense<0.000000e+00> : vector<16x96xf32>
    %140 = tpu.matmul %138, %139, %cst_52 {dimension_numbers = #tpu.dot_dimension_numbers<[1], [0], [0], [1], [0, 0, 1, 1], [], []>} : vector<16x32xbf16>, vector<32x96xbf16>, vector<16x96xf32> -> vector<16x96xf32>
    %c10 = arith.constant 10 : index
    %c0_53 = arith.constant 0 : index
    %141 = vector.load %arg4[%c10, %c0_53] : memref<24x128xf32, #tpu.memory_space<vmem>>, vector<1x96xf32>
    %142 = vector.broadcast %141 : vector<1x96xf32> to vector<16x96xf32>
    %143 = arith.addf %140, %142 : vector<16x96xf32>
    %144 = vector.extract_strided_slice %143 {offsets = [0, 0], sizes = [16, 32], strides = [1, 1]} : vector<16x96xf32> to vector<16x32xf32>
    %145 = vector.extract_strided_slice %143 {offsets = [0, 32], sizes = [16, 32], strides = [1, 1]} : vector<16x96xf32> to vector<16x32xf32>
    %146 = vector.extract_strided_slice %143 {offsets = [0, 64], sizes = [16, 32], strides = [1, 1]} : vector<16x96xf32> to vector<16x32xf32>
    %147 = arith.truncf %145 : vector<16x32xf32> to vector<16x32xbf16>
    %148 = tpu.concatenate %147, %147, %147, %147 in 0 : vector<16x32xbf16>, vector<16x32xbf16>, vector<16x32xbf16>, vector<16x32xbf16> -> vector<64x32xbf16>
    %149 = arith.mulf %148, %0 : vector<64x32xbf16>
    %150 = arith.truncf %146 : vector<16x32xf32> to vector<16x32xbf16>
    %151 = tpu.concatenate %150, %150, %150, %150 in 0 : vector<16x32xbf16>, vector<16x32xbf16>, vector<16x32xbf16>, vector<16x32xbf16> -> vector<64x32xbf16>
    %152 = arith.mulf %151, %0 : vector<64x32xbf16>
    %153 = arith.truncf %144 : vector<16x32xf32> to vector<16x32xbf16>
    %cst_54 = arith.constant dense<0.000000e+00> : vector<16x64xf32>
    %154 = tpu.matmul %153, %149, %cst_54 {dimension_numbers = #tpu.dot_dimension_numbers<[1], [1], [0], [0], [0, 0, 1, 0], [], []>} : vector<16x32xbf16>, vector<64x32xbf16>, vector<16x64xf32> -> vector<16x64xf32>
    %cst_55 = arith.constant 0.353553385 : f32
    %155 = vector.broadcast %cst_55 : f32 to vector<16x64xf32>
    %156 = arith.mulf %154, %155 : vector<16x64xf32>
    %157 = arith.addf %156, %3 : vector<16x64xf32>
    %cst_56 = arith.constant dense<0xFF800000> : vector<16xf32>
    %158 = vector.multi_reduction <maximumf>, %157, %cst_56 [1] : vector<16x64xf32> to vector<16xf32>
    %159 = vector.shape_cast %158 : vector<16xf32> to vector<16x1xf32>
    %160 = vector.broadcast %159 : vector<16x1xf32> to vector<16x64xf32>
    %161 = arith.subf %157, %160 : vector<16x64xf32>
    %162 = math.exp %161 : vector<16x64xf32>
    %163 = arith.truncf %162 : vector<16x64xf32> to vector<16x64xbf16>
    %cst_57 = arith.constant dense<0.000000e+00> : vector<16x64xf32>
    %164 = tpu.matmul %163, %1, %cst_57 {dimension_numbers = #tpu.dot_dimension_numbers<[1], [0], [0], [1], [0, 0, 1, 1], [], []>} : vector<16x64xbf16>, vector<64x64xbf16>, vector<16x64xf32> -> vector<16x64xf32>
    %cst_58 = arith.constant 9.99999968E-21 : f32
    %165 = vector.broadcast %cst_58 : f32 to vector<16x64xf32>
    %166 = arith.maximumf %164, %165 : vector<16x64xf32>
    %167 = tpu.reciprocal %166 {approx = true} : vector<16x64xf32> -> vector<16x64xf32>
    %168 = arith.mulf %162, %167 : vector<16x64xf32>
    %169 = arith.truncf %168 : vector<16x64xf32> to vector<16x64xbf16>
    %cst_59 = arith.constant dense<0.000000e+00> : vector<16x32xf32>
    %170 = tpu.matmul %169, %152, %cst_59 {dimension_numbers = #tpu.dot_dimension_numbers<[1], [0], [0], [1], [0, 0, 1, 1], [], []>} : vector<16x64xbf16>, vector<64x32xbf16>, vector<16x32xf32> -> vector<16x32xf32>
    %171 = arith.truncf %170 : vector<16x32xf32> to vector<16x32xbf16>
    %c256 = arith.constant 256 : index
    %c0_60 = arith.constant 0 : index
    %172 = vector.load %arg3[%c256, %c0_60] : memref<672x128xbf16, #tpu.memory_space<vmem>>, vector<32x32xbf16>
    %cst_61 = arith.constant dense<0.000000e+00> : vector<16x32xf32>
    %173 = tpu.matmul %171, %172, %cst_61 {dimension_numbers = #tpu.dot_dimension_numbers<[1], [0], [0], [1], [0, 0, 1, 1], [], []>} : vector<16x32xbf16>, vector<32x32xbf16>, vector<16x32xf32> -> vector<16x32xf32>
    %c11 = arith.constant 11 : index
    %c0_62 = arith.constant 0 : index
    %174 = vector.load %arg4[%c11, %c0_62] : memref<24x128xf32, #tpu.memory_space<vmem>>, vector<1x32xf32>
    %175 = vector.broadcast %174 : vector<1x32xf32> to vector<16x32xf32>
    %176 = arith.addf %173, %175 : vector<16x32xf32>
    %177 = arith.addf %137, %176 : vector<16x32xf32>
    %c12 = arith.constant 12 : index
    %c0_63 = arith.constant 0 : index
    %178 = vector.load %arg4[%c12, %c0_63] : memref<24x128xf32, #tpu.memory_space<vmem>>, vector<1x32xf32>
    %c13 = arith.constant 13 : index
    %c0_64 = arith.constant 0 : index
    %179 = vector.load %arg4[%c13, %c0_64] : memref<24x128xf32, #tpu.memory_space<vmem>>, vector<1x32xf32>
    %cst_65 = arith.constant dense<0.000000e+00> : vector<16xf32>
    %180 = vector.multi_reduction <add>, %177, %cst_65 [1] : vector<16x32xf32> to vector<16xf32>
    %181 = vector.shape_cast %180 : vector<16xf32> to vector<16x1xf32>
    %cst_66 = arith.constant 3.200000e+01 : f32
    %182 = vector.broadcast %cst_66 : f32 to vector<16x1xf32>
    %183 = arith.divf %181, %182 : vector<16x1xf32>
    %184 = vector.broadcast %183 : vector<16x1xf32> to vector<16x32xf32>
    %185 = arith.subf %177, %184 : vector<16x32xf32>
    %186 = arith.mulf %185, %185 : vector<16x32xf32>
    %cst_67 = arith.constant dense<0.000000e+00> : vector<16xf32>
    %187 = vector.multi_reduction <add>, %186, %cst_67 [1] : vector<16x32xf32> to vector<16xf32>
    %188 = vector.shape_cast %187 : vector<16xf32> to vector<16x1xf32>
    %cst_68 = arith.constant 3.200000e+01 : f32
    %189 = vector.broadcast %cst_68 : f32 to vector<16x1xf32>
    %190 = arith.divf %188, %189 : vector<16x1xf32>
    %cst_69 = arith.constant 9.99999996E-13 : f32
    %191 = vector.broadcast %cst_69 : f32 to vector<16x1xf32>
    %192 = arith.addf %190, %191 : vector<16x1xf32>
    %193 = math.rsqrt %192 : vector<16x1xf32>
    %194 = vector.broadcast %193 : vector<16x1xf32> to vector<16x32xf32>
    %195 = arith.mulf %185, %194 : vector<16x32xf32>
    %196 = vector.broadcast %178 : vector<1x32xf32> to vector<16x32xf32>
    %197 = arith.mulf %195, %196 : vector<16x32xf32>
    %198 = vector.broadcast %179 : vector<1x32xf32> to vector<16x32xf32>
    %199 = arith.addf %197, %198 : vector<16x32xf32>
    %200 = arith.truncf %199 : vector<16x32xf32> to vector<16x32xbf16>
    %c288 = arith.constant 288 : index
    %c0_70 = arith.constant 0 : index
    %201 = vector.load %arg3[%c288, %c0_70] : memref<672x128xbf16, #tpu.memory_space<vmem>>, vector<32x128xbf16>
    %cst_71 = arith.constant dense<0.000000e+00> : vector<16x128xf32>
    %202 = tpu.matmul %200, %201, %cst_71 {dimension_numbers = #tpu.dot_dimension_numbers<[1], [0], [0], [1], [0, 0, 1, 1], [], []>} : vector<16x32xbf16>, vector<32x128xbf16>, vector<16x128xf32> -> vector<16x128xf32>
    %c14 = arith.constant 14 : index
    %c0_72 = arith.constant 0 : index
    %203 = vector.load %arg4[%c14, %c0_72] : memref<24x128xf32, #tpu.memory_space<vmem>>, vector<1x128xf32>
    %204 = vector.broadcast %203 : vector<1x128xf32> to vector<16x128xf32>
    %205 = arith.addf %202, %204 : vector<16x128xf32>
    %206 = arith.mulf %205, %205 : vector<16x128xf32>
    %207 = arith.mulf %205, %206 : vector<16x128xf32>
    %cst_73 = arith.constant 4.471500e-02 : f32
    %208 = vector.broadcast %cst_73 : f32 to vector<16x128xf32>
    %209 = arith.mulf %208, %207 : vector<16x128xf32>
    %210 = arith.addf %205, %209 : vector<16x128xf32>
    %cst_74 = arith.constant 0.797884583 : f32
    %211 = vector.broadcast %cst_74 : f32 to vector<16x128xf32>
    %212 = arith.mulf %211, %210 : vector<16x128xf32>
    %213 = math.tanh %212 : vector<16x128xf32>
    %cst_75 = arith.constant 1.000000e+00 : f32
    %214 = vector.broadcast %cst_75 : f32 to vector<16x128xf32>
    %215 = arith.addf %214, %213 : vector<16x128xf32>
    %cst_76 = arith.constant 5.000000e-01 : f32
    %216 = vector.broadcast %cst_76 : f32 to vector<16x128xf32>
    %217 = arith.mulf %216, %215 : vector<16x128xf32>
    %218 = arith.mulf %205, %217 : vector<16x128xf32>
    %219 = arith.truncf %218 : vector<16x128xf32> to vector<16x128xbf16>
    %c320 = arith.constant 320 : index
    %c0_77 = arith.constant 0 : index
    %220 = vector.load %arg3[%c320, %c0_77] : memref<672x128xbf16, #tpu.memory_space<vmem>>, vector<128x32xbf16>
    %cst_78 = arith.constant dense<0.000000e+00> : vector<16x32xf32>
    %221 = tpu.matmul %219, %220, %cst_78 {dimension_numbers = #tpu.dot_dimension_numbers<[1], [0], [0], [1], [0, 0, 1, 1], [], []>} : vector<16x128xbf16>, vector<128x32xbf16>, vector<16x32xf32> -> vector<16x32xf32>
    %c15 = arith.constant 15 : index
    %c0_79 = arith.constant 0 : index
    %222 = vector.load %arg4[%c15, %c0_79] : memref<24x128xf32, #tpu.memory_space<vmem>>, vector<1x32xf32>
    %223 = vector.broadcast %222 : vector<1x32xf32> to vector<16x32xf32>
    %224 = arith.addf %221, %223 : vector<16x32xf32>
    %225 = arith.addf %199, %224 : vector<16x32xf32>
    %c16 = arith.constant 16 : index
    %c0_80 = arith.constant 0 : index
    %226 = vector.load %arg4[%c16, %c0_80] : memref<24x128xf32, #tpu.memory_space<vmem>>, vector<1x32xf32>
    %c17 = arith.constant 17 : index
    %c0_81 = arith.constant 0 : index
    %227 = vector.load %arg4[%c17, %c0_81] : memref<24x128xf32, #tpu.memory_space<vmem>>, vector<1x32xf32>
    %cst_82 = arith.constant dense<0.000000e+00> : vector<16xf32>
    %228 = vector.multi_reduction <add>, %225, %cst_82 [1] : vector<16x32xf32> to vector<16xf32>
    %229 = vector.shape_cast %228 : vector<16xf32> to vector<16x1xf32>
    %cst_83 = arith.constant 3.200000e+01 : f32
    %230 = vector.broadcast %cst_83 : f32 to vector<16x1xf32>
    %231 = arith.divf %229, %230 : vector<16x1xf32>
    %232 = vector.broadcast %231 : vector<16x1xf32> to vector<16x32xf32>
    %233 = arith.subf %225, %232 : vector<16x32xf32>
    %234 = arith.mulf %233, %233 : vector<16x32xf32>
    %cst_84 = arith.constant dense<0.000000e+00> : vector<16xf32>
    %235 = vector.multi_reduction <add>, %234, %cst_84 [1] : vector<16x32xf32> to vector<16xf32>
    %236 = vector.shape_cast %235 : vector<16xf32> to vector<16x1xf32>
    %cst_85 = arith.constant 3.200000e+01 : f32
    %237 = vector.broadcast %cst_85 : f32 to vector<16x1xf32>
    %238 = arith.divf %236, %237 : vector<16x1xf32>
    %cst_86 = arith.constant 9.99999996E-13 : f32
    %239 = vector.broadcast %cst_86 : f32 to vector<16x1xf32>
    %240 = arith.addf %238, %239 : vector<16x1xf32>
    %241 = math.rsqrt %240 : vector<16x1xf32>
    %242 = vector.broadcast %241 : vector<16x1xf32> to vector<16x32xf32>
    %243 = arith.mulf %233, %242 : vector<16x32xf32>
    %244 = vector.broadcast %226 : vector<1x32xf32> to vector<16x32xf32>
    %245 = arith.mulf %243, %244 : vector<16x32xf32>
    %246 = vector.broadcast %227 : vector<1x32xf32> to vector<16x32xf32>
    %247 = arith.addf %245, %246 : vector<16x32xf32>
    %c23 = arith.constant 23 : index
    %c0_87 = arith.constant 0 : index
    %248 = vector.load %arg4[%c23, %c0_87] : memref<24x128xf32, #tpu.memory_space<vmem>>, vector<1x128xf32>
    %cst_88 = arith.constant 1.000000e+00 : f32
    %249 = vector.broadcast %cst_88 : f32 to vector<1x128xf32>
    %250 = arith.subf %249, %248 : vector<1x128xf32>
    %c20 = arith.constant 20 : index
    %c0_89 = arith.constant 0 : index
    %251 = vector.load %arg4[%c20, %c0_89] : memref<24x128xf32, #tpu.memory_space<vmem>>, vector<1x128xf32>
    %c21 = arith.constant 21 : index
    %c0_90 = arith.constant 0 : index
    %252 = vector.load %arg4[%c21, %c0_90] : memref<24x128xf32, #tpu.memory_space<vmem>>, vector<1x128xf32>
    %c22 = arith.constant 22 : index
    %c0_91 = arith.constant 0 : index
    %253 = vector.load %arg4[%c22, %c0_91] : memref<24x128xf32, #tpu.memory_space<vmem>>, vector<1x128xf32>
    %254 = arith.truncf %247 : vector<16x32xf32> to vector<16x32xbf16>
    %c448 = arith.constant 448 : index
    %c0_92 = arith.constant 0 : index
    %255 = vector.load %arg3[%c448, %c0_92] : memref<672x128xbf16, #tpu.memory_space<vmem>>, vector<32x128xbf16>
    %cst_93 = arith.constant dense<0.000000e+00> : vector<16x128xf32>
    %256 = tpu.matmul %254, %255, %cst_93 {dimension_numbers = #tpu.dot_dimension_numbers<[1], [0], [0], [1], [0, 0, 1, 1], [], []>} : vector<16x32xbf16>, vector<32x128xbf16>, vector<16x128xf32> -> vector<16x128xf32>
    %c18 = arith.constant 18 : index
    %c0_94 = arith.constant 0 : index
    %257 = vector.load %arg4[%c18, %c0_94] : memref<24x128xf32, #tpu.memory_space<vmem>>, vector<1x128xf32>
    %258 = vector.broadcast %257 : vector<1x128xf32> to vector<16x128xf32>
    %259 = arith.addf %256, %258 : vector<16x128xf32>
    %260 = vector.extract_strided_slice %259 {offsets = [0, 0], sizes = [1, 128], strides = [1, 1]} : vector<16x128xf32> to vector<1x128xf32>
    %261 = vector.extract_strided_slice %259 {offsets = [8, 0], sizes = [1, 128], strides = [1, 1]} : vector<16x128xf32> to vector<1x128xf32>
    %262 = tpu.concatenate %260, %261 in 0 : vector<1x128xf32>, vector<1x128xf32> -> vector<2x128xf32>
    %263 = vector.extract_strided_slice %259 {offsets = [7, 0], sizes = [1, 128], strides = [1, 1]} : vector<16x128xf32> to vector<1x128xf32>
    %264 = vector.extract_strided_slice %259 {offsets = [15, 0], sizes = [1, 128], strides = [1, 1]} : vector<16x128xf32> to vector<1x128xf32>
    %265 = tpu.concatenate %263, %264 in 0 : vector<1x128xf32>, vector<1x128xf32> -> vector<2x128xf32>
    %266 = vector.broadcast %248 : vector<1x128xf32> to vector<2x128xf32>
    %267 = arith.mulf %266, %262 : vector<2x128xf32>
    %268 = vector.broadcast %250 : vector<1x128xf32> to vector<2x128xf32>
    %269 = arith.mulf %268, %265 : vector<2x128xf32>
    %270 = arith.addf %267, %269 : vector<2x128xf32>
    %271 = vector.extract_strided_slice %259 {offsets = [1, 0], sizes = [1, 128], strides = [1, 1]} : vector<16x128xf32> to vector<1x128xf32>
    %272 = vector.extract_strided_slice %259 {offsets = [9, 0], sizes = [1, 128], strides = [1, 1]} : vector<16x128xf32> to vector<1x128xf32>
    %273 = tpu.concatenate %271, %272 in 0 : vector<1x128xf32>, vector<1x128xf32> -> vector<2x128xf32>
    %274 = vector.extract_strided_slice %259 {offsets = [6, 0], sizes = [1, 128], strides = [1, 1]} : vector<16x128xf32> to vector<1x128xf32>
    %275 = vector.extract_strided_slice %259 {offsets = [14, 0], sizes = [1, 128], strides = [1, 1]} : vector<16x128xf32> to vector<1x128xf32>
    %276 = tpu.concatenate %274, %275 in 0 : vector<1x128xf32>, vector<1x128xf32> -> vector<2x128xf32>
    %277 = vector.broadcast %248 : vector<1x128xf32> to vector<2x128xf32>
    %278 = arith.mulf %277, %273 : vector<2x128xf32>
    %279 = vector.broadcast %250 : vector<1x128xf32> to vector<2x128xf32>
    %280 = arith.mulf %279, %276 : vector<2x128xf32>
    %281 = arith.addf %278, %280 : vector<2x128xf32>
    %282 = vector.extract_strided_slice %259 {offsets = [2, 0], sizes = [1, 128], strides = [1, 1]} : vector<16x128xf32> to vector<1x128xf32>
    %283 = vector.extract_strided_slice %259 {offsets = [10, 0], sizes = [1, 128], strides = [1, 1]} : vector<16x128xf32> to vector<1x128xf32>
    %284 = tpu.concatenate %282, %283 in 0 : vector<1x128xf32>, vector<1x128xf32> -> vector<2x128xf32>
    %285 = vector.extract_strided_slice %259 {offsets = [5, 0], sizes = [1, 128], strides = [1, 1]} : vector<16x128xf32> to vector<1x128xf32>
    %286 = vector.extract_strided_slice %259 {offsets = [13, 0], sizes = [1, 128], strides = [1, 1]} : vector<16x128xf32> to vector<1x128xf32>
    %287 = tpu.concatenate %285, %286 in 0 : vector<1x128xf32>, vector<1x128xf32> -> vector<2x128xf32>
    %288 = vector.broadcast %248 : vector<1x128xf32> to vector<2x128xf32>
    %289 = arith.mulf %288, %284 : vector<2x128xf32>
    %290 = vector.broadcast %250 : vector<1x128xf32> to vector<2x128xf32>
    %291 = arith.mulf %290, %287 : vector<2x128xf32>
    %292 = arith.addf %289, %291 : vector<2x128xf32>
    %293 = vector.extract_strided_slice %259 {offsets = [3, 0], sizes = [1, 128], strides = [1, 1]} : vector<16x128xf32> to vector<1x128xf32>
    %294 = vector.extract_strided_slice %259 {offsets = [11, 0], sizes = [1, 128], strides = [1, 1]} : vector<16x128xf32> to vector<1x128xf32>
    %295 = tpu.concatenate %293, %294 in 0 : vector<1x128xf32>, vector<1x128xf32> -> vector<2x128xf32>
    %296 = vector.extract_strided_slice %259 {offsets = [4, 0], sizes = [1, 128], strides = [1, 1]} : vector<16x128xf32> to vector<1x128xf32>
    %297 = vector.extract_strided_slice %259 {offsets = [12, 0], sizes = [1, 128], strides = [1, 1]} : vector<16x128xf32> to vector<1x128xf32>
    %298 = tpu.concatenate %296, %297 in 0 : vector<1x128xf32>, vector<1x128xf32> -> vector<2x128xf32>
    %299 = vector.broadcast %248 : vector<1x128xf32> to vector<2x128xf32>
    %300 = arith.mulf %299, %295 : vector<2x128xf32>
    %301 = vector.broadcast %250 : vector<1x128xf32> to vector<2x128xf32>
    %302 = arith.mulf %301, %298 : vector<2x128xf32>
    %303 = arith.addf %300, %302 : vector<2x128xf32>
    %304 = vector.extract_strided_slice %259 {offsets = [4, 0], sizes = [1, 128], strides = [1, 1]} : vector<16x128xf32> to vector<1x128xf32>
    %305 = vector.extract_strided_slice %259 {offsets = [12, 0], sizes = [1, 128], strides = [1, 1]} : vector<16x128xf32> to vector<1x128xf32>
    %306 = tpu.concatenate %304, %305 in 0 : vector<1x128xf32>, vector<1x128xf32> -> vector<2x128xf32>
    %307 = vector.extract_strided_slice %259 {offsets = [3, 0], sizes = [1, 128], strides = [1, 1]} : vector<16x128xf32> to vector<1x128xf32>
    %308 = vector.extract_strided_slice %259 {offsets = [11, 0], sizes = [1, 128], strides = [1, 1]} : vector<16x128xf32> to vector<1x128xf32>
    %309 = tpu.concatenate %307, %308 in 0 : vector<1x128xf32>, vector<1x128xf32> -> vector<2x128xf32>
    %310 = vector.broadcast %248 : vector<1x128xf32> to vector<2x128xf32>
    %311 = arith.mulf %310, %306 : vector<2x128xf32>
    %312 = vector.broadcast %250 : vector<1x128xf32> to vector<2x128xf32>
    %313 = arith.mulf %312, %309 : vector<2x128xf32>
    %314 = arith.addf %311, %313 : vector<2x128xf32>
    %315 = vector.extract_strided_slice %259 {offsets = [5, 0], sizes = [1, 128], strides = [1, 1]} : vector<16x128xf32> to vector<1x128xf32>
    %316 = vector.extract_strided_slice %259 {offsets = [13, 0], sizes = [1, 128], strides = [1, 1]} : vector<16x128xf32> to vector<1x128xf32>
    %317 = tpu.concatenate %315, %316 in 0 : vector<1x128xf32>, vector<1x128xf32> -> vector<2x128xf32>
    %318 = vector.extract_strided_slice %259 {offsets = [2, 0], sizes = [1, 128], strides = [1, 1]} : vector<16x128xf32> to vector<1x128xf32>
    %319 = vector.extract_strided_slice %259 {offsets = [10, 0], sizes = [1, 128], strides = [1, 1]} : vector<16x128xf32> to vector<1x128xf32>
    %320 = tpu.concatenate %318, %319 in 0 : vector<1x128xf32>, vector<1x128xf32> -> vector<2x128xf32>
    %321 = vector.broadcast %248 : vector<1x128xf32> to vector<2x128xf32>
    %322 = arith.mulf %321, %317 : vector<2x128xf32>
    %323 = vector.broadcast %250 : vector<1x128xf32> to vector<2x128xf32>
    %324 = arith.mulf %323, %320 : vector<2x128xf32>
    %325 = arith.addf %322, %324 : vector<2x128xf32>
    %326 = vector.extract_strided_slice %259 {offsets = [6, 0], sizes = [1, 128], strides = [1, 1]} : vector<16x128xf32> to vector<1x128xf32>
    %327 = vector.extract_strided_slice %259 {offsets = [14, 0], sizes = [1, 128], strides = [1, 1]} : vector<16x128xf32> to vector<1x128xf32>
    %328 = tpu.concatenate %326, %327 in 0 : vector<1x128xf32>, vector<1x128xf32> -> vector<2x128xf32>
    %329 = vector.extract_strided_slice %259 {offsets = [1, 0], sizes = [1, 128], strides = [1, 1]} : vector<16x128xf32> to vector<1x128xf32>
    %330 = vector.extract_strided_slice %259 {offsets = [9, 0], sizes = [1, 128], strides = [1, 1]} : vector<16x128xf32> to vector<1x128xf32>
    %331 = tpu.concatenate %329, %330 in 0 : vector<1x128xf32>, vector<1x128xf32> -> vector<2x128xf32>
    %332 = vector.broadcast %248 : vector<1x128xf32> to vector<2x128xf32>
    %333 = arith.mulf %332, %328 : vector<2x128xf32>
    %334 = vector.broadcast %250 : vector<1x128xf32> to vector<2x128xf32>
    %335 = arith.mulf %334, %331 : vector<2x128xf32>
    %336 = arith.addf %333, %335 : vector<2x128xf32>
    %337 = vector.extract_strided_slice %259 {offsets = [7, 0], sizes = [1, 128], strides = [1, 1]} : vector<16x128xf32> to vector<1x128xf32>
    %338 = vector.extract_strided_slice %259 {offsets = [15, 0], sizes = [1, 128], strides = [1, 1]} : vector<16x128xf32> to vector<1x128xf32>
    %339 = tpu.concatenate %337, %338 in 0 : vector<1x128xf32>, vector<1x128xf32> -> vector<2x128xf32>
    %340 = vector.extract_strided_slice %259 {offsets = [0, 0], sizes = [1, 128], strides = [1, 1]} : vector<16x128xf32> to vector<1x128xf32>
    %341 = vector.extract_strided_slice %259 {offsets = [8, 0], sizes = [1, 128], strides = [1, 1]} : vector<16x128xf32> to vector<1x128xf32>
    %342 = tpu.concatenate %340, %341 in 0 : vector<1x128xf32>, vector<1x128xf32> -> vector<2x128xf32>
    %343 = vector.broadcast %248 : vector<1x128xf32> to vector<2x128xf32>
    %344 = arith.mulf %343, %339 : vector<2x128xf32>
    %345 = vector.broadcast %250 : vector<1x128xf32> to vector<2x128xf32>
    %346 = arith.mulf %345, %342 : vector<2x128xf32>
    %347 = arith.addf %344, %346 : vector<2x128xf32>
    %c480 = arith.constant 480 : index
    %c0_95 = arith.constant 0 : index
    %348 = vector.load %arg3[%c480, %c0_95] : memref<672x128xbf16, #tpu.memory_space<vmem>>, vector<32x128xbf16>
    %cst_96 = arith.constant 0.000000e+00 : f32
    %349 = vector.broadcast %cst_96 : f32 to vector<2x32xf32>
    %cst_97 = arith.constant 0.000000e+00 : f32
    %350 = vector.broadcast %cst_97 : f32 to vector<2x32xf32>
    %351 = arith.truncf %349 : vector<2x32xf32> to vector<2x32xbf16>
    %cst_98 = arith.constant dense<0.000000e+00> : vector<2x128xf32>
    %352 = tpu.matmul %351, %348, %cst_98 {dimension_numbers = #tpu.dot_dimension_numbers<[1], [0], [0], [1], [0, 0, 1, 1], [], []>} : vector<2x32xbf16>, vector<32x128xbf16>, vector<2x128xf32> -> vector<2x128xf32>
    %353 = arith.addf %270, %352 : vector<2x128xf32>
    %354 = vector.broadcast %251 : vector<1x128xf32> to vector<2x128xf32>
    %355 = arith.mulf %353, %354 : vector<2x128xf32>
    %356 = math.tanh %355 : vector<2x128xf32>
    %357 = vector.broadcast %252 : vector<1x128xf32> to vector<2x128xf32>
    %358 = arith.mulf %356, %357 : vector<2x128xf32>
    %359 = vector.broadcast %253 : vector<1x128xf32> to vector<2x128xf32>
    %360 = arith.addf %358, %359 : vector<2x128xf32>
    %361 = vector.extract_strided_slice %360 {offsets = [0, 0], sizes = [2, 32], strides = [1, 1]} : vector<2x128xf32> to vector<2x32xf32>
    %362 = vector.extract_strided_slice %360 {offsets = [0, 32], sizes = [2, 32], strides = [1, 1]} : vector<2x128xf32> to vector<2x32xf32>
    %363 = vector.extract_strided_slice %360 {offsets = [0, 64], sizes = [2, 32], strides = [1, 1]} : vector<2x128xf32> to vector<2x32xf32>
    %364 = vector.extract_strided_slice %360 {offsets = [0, 96], sizes = [2, 32], strides = [1, 1]} : vector<2x128xf32> to vector<2x32xf32>
    %365 = arith.mulf %362, %350 : vector<2x32xf32>
    %366 = arith.mulf %361, %363 : vector<2x32xf32>
    %367 = arith.addf %365, %366 : vector<2x32xf32>
    %368 = math.tanh %367 : vector<2x32xf32>
    %369 = arith.mulf %364, %368 : vector<2x32xf32>
    %370 = arith.truncf %369 : vector<2x32xf32> to vector<2x32xbf16>
    %cst_99 = arith.constant dense<0.000000e+00> : vector<2x128xf32>
    %371 = tpu.matmul %370, %348, %cst_99 {dimension_numbers = #tpu.dot_dimension_numbers<[1], [0], [0], [1], [0, 0, 1, 1], [], []>} : vector<2x32xbf16>, vector<32x128xbf16>, vector<2x128xf32> -> vector<2x128xf32>
    %372 = arith.addf %281, %371 : vector<2x128xf32>
    %373 = vector.broadcast %251 : vector<1x128xf32> to vector<2x128xf32>
    %374 = arith.mulf %372, %373 : vector<2x128xf32>
    %375 = math.tanh %374 : vector<2x128xf32>
    %376 = vector.broadcast %252 : vector<1x128xf32> to vector<2x128xf32>
    %377 = arith.mulf %375, %376 : vector<2x128xf32>
    %378 = vector.broadcast %253 : vector<1x128xf32> to vector<2x128xf32>
    %379 = arith.addf %377, %378 : vector<2x128xf32>
    %380 = vector.extract_strided_slice %379 {offsets = [0, 0], sizes = [2, 32], strides = [1, 1]} : vector<2x128xf32> to vector<2x32xf32>
    %381 = vector.extract_strided_slice %379 {offsets = [0, 32], sizes = [2, 32], strides = [1, 1]} : vector<2x128xf32> to vector<2x32xf32>
    %382 = vector.extract_strided_slice %379 {offsets = [0, 64], sizes = [2, 32], strides = [1, 1]} : vector<2x128xf32> to vector<2x32xf32>
    %383 = vector.extract_strided_slice %379 {offsets = [0, 96], sizes = [2, 32], strides = [1, 1]} : vector<2x128xf32> to vector<2x32xf32>
    %384 = arith.mulf %381, %367 : vector<2x32xf32>
    %385 = arith.mulf %380, %382 : vector<2x32xf32>
    %386 = arith.addf %384, %385 : vector<2x32xf32>
    %387 = math.tanh %386 : vector<2x32xf32>
    %388 = arith.mulf %383, %387 : vector<2x32xf32>
    %389 = arith.truncf %388 : vector<2x32xf32> to vector<2x32xbf16>
    %cst_100 = arith.constant dense<0.000000e+00> : vector<2x128xf32>
    %390 = tpu.matmul %389, %348, %cst_100 {dimension_numbers = #tpu.dot_dimension_numbers<[1], [0], [0], [1], [0, 0, 1, 1], [], []>} : vector<2x32xbf16>, vector<32x128xbf16>, vector<2x128xf32> -> vector<2x128xf32>
    %391 = arith.addf %292, %390 : vector<2x128xf32>
    %392 = vector.broadcast %251 : vector<1x128xf32> to vector<2x128xf32>
    %393 = arith.mulf %391, %392 : vector<2x128xf32>
    %394 = math.tanh %393 : vector<2x128xf32>
    %395 = vector.broadcast %252 : vector<1x128xf32> to vector<2x128xf32>
    %396 = arith.mulf %394, %395 : vector<2x128xf32>
    %397 = vector.broadcast %253 : vector<1x128xf32> to vector<2x128xf32>
    %398 = arith.addf %396, %397 : vector<2x128xf32>
    %399 = vector.extract_strided_slice %398 {offsets = [0, 0], sizes = [2, 32], strides = [1, 1]} : vector<2x128xf32> to vector<2x32xf32>
    %400 = vector.extract_strided_slice %398 {offsets = [0, 32], sizes = [2, 32], strides = [1, 1]} : vector<2x128xf32> to vector<2x32xf32>
    %401 = vector.extract_strided_slice %398 {offsets = [0, 64], sizes = [2, 32], strides = [1, 1]} : vector<2x128xf32> to vector<2x32xf32>
    %402 = vector.extract_strided_slice %398 {offsets = [0, 96], sizes = [2, 32], strides = [1, 1]} : vector<2x128xf32> to vector<2x32xf32>
    %403 = arith.mulf %400, %386 : vector<2x32xf32>
    %404 = arith.mulf %399, %401 : vector<2x32xf32>
    %405 = arith.addf %403, %404 : vector<2x32xf32>
    %406 = math.tanh %405 : vector<2x32xf32>
    %407 = arith.mulf %402, %406 : vector<2x32xf32>
    %408 = arith.truncf %407 : vector<2x32xf32> to vector<2x32xbf16>
    %cst_101 = arith.constant dense<0.000000e+00> : vector<2x128xf32>
    %409 = tpu.matmul %408, %348, %cst_101 {dimension_numbers = #tpu.dot_dimension_numbers<[1], [0], [0], [1], [0, 0, 1, 1], [], []>} : vector<2x32xbf16>, vector<32x128xbf16>, vector<2x128xf32> -> vector<2x128xf32>
    %410 = arith.addf %303, %409 : vector<2x128xf32>
    %411 = vector.broadcast %251 : vector<1x128xf32> to vector<2x128xf32>
    %412 = arith.mulf %410, %411 : vector<2x128xf32>
    %413 = math.tanh %412 : vector<2x128xf32>
    %414 = vector.broadcast %252 : vector<1x128xf32> to vector<2x128xf32>
    %415 = arith.mulf %413, %414 : vector<2x128xf32>
    %416 = vector.broadcast %253 : vector<1x128xf32> to vector<2x128xf32>
    %417 = arith.addf %415, %416 : vector<2x128xf32>
    %418 = vector.extract_strided_slice %417 {offsets = [0, 0], sizes = [2, 32], strides = [1, 1]} : vector<2x128xf32> to vector<2x32xf32>
    %419 = vector.extract_strided_slice %417 {offsets = [0, 32], sizes = [2, 32], strides = [1, 1]} : vector<2x128xf32> to vector<2x32xf32>
    %420 = vector.extract_strided_slice %417 {offsets = [0, 64], sizes = [2, 32], strides = [1, 1]} : vector<2x128xf32> to vector<2x32xf32>
    %421 = vector.extract_strided_slice %417 {offsets = [0, 96], sizes = [2, 32], strides = [1, 1]} : vector<2x128xf32> to vector<2x32xf32>
    %422 = arith.mulf %419, %405 : vector<2x32xf32>
    %423 = arith.mulf %418, %420 : vector<2x32xf32>
    %424 = arith.addf %422, %423 : vector<2x32xf32>
    %425 = math.tanh %424 : vector<2x32xf32>
    %426 = arith.mulf %421, %425 : vector<2x32xf32>
    %427 = arith.truncf %426 : vector<2x32xf32> to vector<2x32xbf16>
    %cst_102 = arith.constant dense<0.000000e+00> : vector<2x128xf32>
    %428 = tpu.matmul %427, %348, %cst_102 {dimension_numbers = #tpu.dot_dimension_numbers<[1], [0], [0], [1], [0, 0, 1, 1], [], []>} : vector<2x32xbf16>, vector<32x128xbf16>, vector<2x128xf32> -> vector<2x128xf32>
    %429 = arith.addf %314, %428 : vector<2x128xf32>
    %430 = vector.broadcast %251 : vector<1x128xf32> to vector<2x128xf32>
    %431 = arith.mulf %429, %430 : vector<2x128xf32>
    %432 = math.tanh %431 : vector<2x128xf32>
    %433 = vector.broadcast %252 : vector<1x128xf32> to vector<2x128xf32>
    %434 = arith.mulf %432, %433 : vector<2x128xf32>
    %435 = vector.broadcast %253 : vector<1x128xf32> to vector<2x128xf32>
    %436 = arith.addf %434, %435 : vector<2x128xf32>
    %437 = vector.extract_strided_slice %436 {offsets = [0, 0], sizes = [2, 32], strides = [1, 1]} : vector<2x128xf32> to vector<2x32xf32>
    %438 = vector.extract_strided_slice %436 {offsets = [0, 32], sizes = [2, 32], strides = [1, 1]} : vector<2x128xf32> to vector<2x32xf32>
    %439 = vector.extract_strided_slice %436 {offsets = [0, 64], sizes = [2, 32], strides = [1, 1]} : vector<2x128xf32> to vector<2x32xf32>
    %440 = vector.extract_strided_slice %436 {offsets = [0, 96], sizes = [2, 32], strides = [1, 1]} : vector<2x128xf32> to vector<2x32xf32>
    %441 = arith.mulf %438, %424 : vector<2x32xf32>
    %442 = arith.mulf %437, %439 : vector<2x32xf32>
    %443 = arith.addf %441, %442 : vector<2x32xf32>
    %444 = math.tanh %443 : vector<2x32xf32>
    %445 = arith.mulf %440, %444 : vector<2x32xf32>
    %446 = arith.truncf %445 : vector<2x32xf32> to vector<2x32xbf16>
    %cst_103 = arith.constant dense<0.000000e+00> : vector<2x128xf32>
    %447 = tpu.matmul %446, %348, %cst_103 {dimension_numbers = #tpu.dot_dimension_numbers<[1], [0], [0], [1], [0, 0, 1, 1], [], []>} : vector<2x32xbf16>, vector<32x128xbf16>, vector<2x128xf32> -> vector<2x128xf32>
    %448 = arith.addf %325, %447 : vector<2x128xf32>
    %449 = vector.broadcast %251 : vector<1x128xf32> to vector<2x128xf32>
    %450 = arith.mulf %448, %449 : vector<2x128xf32>
    %451 = math.tanh %450 : vector<2x128xf32>
    %452 = vector.broadcast %252 : vector<1x128xf32> to vector<2x128xf32>
    %453 = arith.mulf %451, %452 : vector<2x128xf32>
    %454 = vector.broadcast %253 : vector<1x128xf32> to vector<2x128xf32>
    %455 = arith.addf %453, %454 : vector<2x128xf32>
    %456 = vector.extract_strided_slice %455 {offsets = [0, 0], sizes = [2, 32], strides = [1, 1]} : vector<2x128xf32> to vector<2x32xf32>
    %457 = vector.extract_strided_slice %455 {offsets = [0, 32], sizes = [2, 32], strides = [1, 1]} : vector<2x128xf32> to vector<2x32xf32>
    %458 = vector.extract_strided_slice %455 {offsets = [0, 64], sizes = [2, 32], strides = [1, 1]} : vector<2x128xf32> to vector<2x32xf32>
    %459 = vector.extract_strided_slice %455 {offsets = [0, 96], sizes = [2, 32], strides = [1, 1]} : vector<2x128xf32> to vector<2x32xf32>
    %460 = arith.mulf %457, %443 : vector<2x32xf32>
    %461 = arith.mulf %456, %458 : vector<2x32xf32>
    %462 = arith.addf %460, %461 : vector<2x32xf32>
    %463 = math.tanh %462 : vector<2x32xf32>
    %464 = arith.mulf %459, %463 : vector<2x32xf32>
    %465 = arith.truncf %464 : vector<2x32xf32> to vector<2x32xbf16>
    %cst_104 = arith.constant dense<0.000000e+00> : vector<2x128xf32>
    %466 = tpu.matmul %465, %348, %cst_104 {dimension_numbers = #tpu.dot_dimension_numbers<[1], [0], [0], [1], [0, 0, 1, 1], [], []>} : vector<2x32xbf16>, vector<32x128xbf16>, vector<2x128xf32> -> vector<2x128xf32>
    %467 = arith.addf %336, %466 : vector<2x128xf32>
    %468 = vector.broadcast %251 : vector<1x128xf32> to vector<2x128xf32>
    %469 = arith.mulf %467, %468 : vector<2x128xf32>
    %470 = math.tanh %469 : vector<2x128xf32>
    %471 = vector.broadcast %252 : vector<1x128xf32> to vector<2x128xf32>
    %472 = arith.mulf %470, %471 : vector<2x128xf32>
    %473 = vector.broadcast %253 : vector<1x128xf32> to vector<2x128xf32>
    %474 = arith.addf %472, %473 : vector<2x128xf32>
    %475 = vector.extract_strided_slice %474 {offsets = [0, 0], sizes = [2, 32], strides = [1, 1]} : vector<2x128xf32> to vector<2x32xf32>
    %476 = vector.extract_strided_slice %474 {offsets = [0, 32], sizes = [2, 32], strides = [1, 1]} : vector<2x128xf32> to vector<2x32xf32>
    %477 = vector.extract_strided_slice %474 {offsets = [0, 64], sizes = [2, 32], strides = [1, 1]} : vector<2x128xf32> to vector<2x32xf32>
    %478 = vector.extract_strided_slice %474 {offsets = [0, 96], sizes = [2, 32], strides = [1, 1]} : vector<2x128xf32> to vector<2x32xf32>
    %479 = arith.mulf %476, %462 : vector<2x32xf32>
    %480 = arith.mulf %475, %477 : vector<2x32xf32>
    %481 = arith.addf %479, %480 : vector<2x32xf32>
    %482 = math.tanh %481 : vector<2x32xf32>
    %483 = arith.mulf %478, %482 : vector<2x32xf32>
    %484 = arith.truncf %483 : vector<2x32xf32> to vector<2x32xbf16>
    %cst_105 = arith.constant dense<0.000000e+00> : vector<2x128xf32>
    %485 = tpu.matmul %484, %348, %cst_105 {dimension_numbers = #tpu.dot_dimension_numbers<[1], [0], [0], [1], [0, 0, 1, 1], [], []>} : vector<2x32xbf16>, vector<32x128xbf16>, vector<2x128xf32> -> vector<2x128xf32>
    %486 = arith.addf %347, %485 : vector<2x128xf32>
    %487 = vector.broadcast %251 : vector<1x128xf32> to vector<2x128xf32>
    %488 = arith.mulf %486, %487 : vector<2x128xf32>
    %489 = math.tanh %488 : vector<2x128xf32>
    %490 = vector.broadcast %252 : vector<1x128xf32> to vector<2x128xf32>
    %491 = arith.mulf %489, %490 : vector<2x128xf32>
    %492 = vector.broadcast %253 : vector<1x128xf32> to vector<2x128xf32>
    %493 = arith.addf %491, %492 : vector<2x128xf32>
    %494 = vector.extract_strided_slice %493 {offsets = [0, 0], sizes = [2, 32], strides = [1, 1]} : vector<2x128xf32> to vector<2x32xf32>
    %495 = vector.extract_strided_slice %493 {offsets = [0, 32], sizes = [2, 32], strides = [1, 1]} : vector<2x128xf32> to vector<2x32xf32>
    %496 = vector.extract_strided_slice %493 {offsets = [0, 64], sizes = [2, 32], strides = [1, 1]} : vector<2x128xf32> to vector<2x32xf32>
    %497 = vector.extract_strided_slice %493 {offsets = [0, 96], sizes = [2, 32], strides = [1, 1]} : vector<2x128xf32> to vector<2x32xf32>
    %498 = arith.mulf %495, %481 : vector<2x32xf32>
    %499 = arith.mulf %494, %496 : vector<2x32xf32>
    %500 = arith.addf %498, %499 : vector<2x32xf32>
    %501 = math.tanh %500 : vector<2x32xf32>
    %502 = arith.mulf %497, %501 : vector<2x32xf32>
    %503 = arith.truncf %502 : vector<2x32xf32> to vector<2x32xbf16>
    %c512 = arith.constant 512 : index
    %c0_106 = arith.constant 0 : index
    %504 = vector.load %arg3[%c512, %c0_106] : memref<672x128xbf16, #tpu.memory_space<vmem>>, vector<32x4xbf16>
    %cst_107 = arith.constant dense<0.000000e+00> : vector<2x4xf32>
    %505 = tpu.matmul %503, %504, %cst_107 {dimension_numbers = #tpu.dot_dimension_numbers<[1], [0], [0], [1], [0, 0, 1, 1], [], []>} : vector<2x32xbf16>, vector<32x4xbf16>, vector<2x4xf32> -> vector<2x4xf32>
    %c19 = arith.constant 19 : index
    %c0_108 = arith.constant 0 : index
    %506 = vector.load %arg4[%c19, %c0_108] : memref<24x128xf32, #tpu.memory_space<vmem>>, vector<1x4xf32>
    %507 = vector.broadcast %506 : vector<1x4xf32> to vector<2x4xf32>
    %508 = arith.addf %505, %507 : vector<2x4xf32>
    %cst_109 = arith.constant 0.000000e+00 : f32
    %509 = vector.broadcast %cst_109 : f32 to vector<2x4xf32>
    %510 = arith.maximumf %508, %509 : vector<2x4xf32>
    %cst_110 = arith.constant dense<0xFF800000> : vector<2xf32>
    %511 = vector.multi_reduction <maximumf>, %510, %cst_110 [1] : vector<2x4xf32> to vector<2xf32>
    %512 = vector.shape_cast %511 : vector<2xf32> to vector<2x1xf32>
    %513 = vector.broadcast %512 : vector<2x1xf32> to vector<2x4xf32>
    %514 = arith.subf %510, %513 : vector<2x4xf32>
    %515 = math.exp %514 : vector<2x4xf32>
    %cst_111 = arith.constant dense<0.000000e+00> : vector<2xf32>
    %516 = vector.multi_reduction <add>, %515, %cst_111 [1] : vector<2x4xf32> to vector<2xf32>
    %517 = vector.shape_cast %516 : vector<2xf32> to vector<2x1xf32>
    %518 = vector.broadcast %517 : vector<2x1xf32> to vector<2x4xf32>
    %519 = arith.divf %515, %518 : vector<2x4xf32>
    %cst_112 = arith.constant 0.000000e+00 : f32
    %520 = vector.broadcast %cst_112 : f32 to vector<2x124xf32>
    %521 = tpu.concatenate %519, %520 in 1 : vector<2x4xf32>, vector<2x124xf32> -> vector<2x128xf32>
    %c0_113 = arith.constant 0 : index
    %c0_114 = arith.constant 0 : index
    %c0_115 = arith.constant 0 : index
    %522 = vector.load %arg5[%c0_113, %c0_114, %c0_115] : memref<1x2x128xf32, #tpu.memory_space<vmem>>, vector<1x2x128xf32>
    %523 = vector.shape_cast %522 : vector<1x2x128xf32> to vector<2x128xf32>
    %524 = vector.shape_cast %521 : vector<2x128xf32> to vector<1x2x128xf32>
    tpu.vector_store %arg5[%c0_113, %c0_114, %c0_115], %524 {strides = array<i32>} : memref<1x2x128xf32, #tpu.memory_space<vmem>>, vector<1x2x128xf32>,
    return
  }
  func.func @transform_0(%arg0: i32) -> (i32, i32, i32) {
    %c0_i32 = arith.constant 0 : i32
    %c0_i32_0 = arith.constant 0 : i32
    %c0_i32_1 = arith.constant 0 : i32
    return %arg0, %c0_i32, %c0_i32_0 : i32, i32, i32
  }
  func.func @transform_1(%arg0: i32) -> (i32, i32, i32) {
    %c0_i32 = arith.constant 0 : i32
    %c0_i32_0 = arith.constant 0 : i32
    %c0_i32_1 = arith.constant 0 : i32
    return %arg0, %c0_i32, %c0_i32_0 : i32, i32, i32
  }
  func.func @transform_2(%arg0: i32) -> (i32, i32) {
    %c0_i32 = arith.constant 0 : i32
    %c0_i32_0 = arith.constant 0 : i32
    %c0_i32_1 = arith.constant 0 : i32
    return %c0_i32, %c0_i32_0 : i32, i32
  }
  func.func @transform_3(%arg0: i32) -> (i32, i32) {
    %c0_i32 = arith.constant 0 : i32
    %c0_i32_0 = arith.constant 0 : i32
    %c0_i32_1 = arith.constant 0 : i32
    return %c0_i32, %c0_i32_0 : i32, i32
  }
  func.func @transform_4(%arg0: i32) -> (i32, i32, i32) {
    %c0_i32 = arith.constant 0 : i32
    %c0_i32_0 = arith.constant 0 : i32
    %c0_i32_1 = arith.constant 0 : i32
    return %arg0, %c0_i32, %c0_i32_0 : i32, i32, i32
  }
}

</mosaic_0001>

<bundles_post_ra>
// kernel: bert_bilstm_forward.1
= control target key start
LH: loop header
LB: loop body
LE: loop exit
PB: predicated region body
PF: predicated region fallthrough
CT: control target
= control target key end

     0   :  { %vm41_vm0 = vcmask 261120   ;;  %s3447_s0 = inlined_call_operand.vmem [shape: f32[1,16,32], index: 0, kind: input, shape index: {}]   ;;  %s3448_s1 = inlined_call_operand.vmem [shape: f32[1,16,64], index: 1, kind: input, shape index: {}]   ;;  %s3449_s2 = inlined_call_operand.vmem [shape: bf16[672,128], index: 2, kind: input, shape index: {}]   ;;  %s3450_s3 = inlined_call_operand.vmem [shape: f32[24,128], index: 3, kind: input, shape index: {}]   ;;  %s3451_s4 = inlined_call_operand.hbm [shape: f32[1,2,128], index: 4, kind: output, shape index: {}]  }
   0x1   :  { %v37_v0 = vld [vmem:[%s3447_s0] sm:$0xff]  ;;  %v38_v1 = vld [vmem:[%s3447_s0 + $0x8] sm:$0xff] }
   0x2   :  { %v42_v2 = vsel %vm41_vm0, %v37_v0, 0.0  ;;  %v45_v3 = vsel %vm41_vm0, %v38_v1, 0.0 }
   0x3   :  { %43 = vadd.xlane.f32.xlu0 %v42_v2 }
   0x7   :  { %46 = vadd.xlane.f32.xlu0 %v45_v3 }
   0x8   :  { %9 = vsyncpa [#allocation3], 0  ;;  %v2627_v14 = vld [vmem:[%s3449_s2] sm:$0xff]   ;;  %v2773_v15 = vmov 0.0   ;;  %v2628_v16 = vld [vmem:[%s3449_s2 + $0x8] sm:$0xff]   ;;  %vm2774_vm1 = vmmov 0  }
   0x9   :  { %2380 = vmatprep.subr.bf16.mxu0 %v2773_v15  ;;  %2388 = vmatprep.subr.bf16.mxu1 %v2773_v15  ;;  %v2832_v17 = vld [vmem:[%s3449_s2 + $0x118] sm:$0xff]   ;;  %v2837_v18 = vld [vmem:[%s3449_s2 + $0x110] sm:$0xff]   ;;  %s2775_s26 = smov 32   ;;  %v2844_v19 = vld [vmem:[%s3449_s2 + $0x120] sm:$0xff]   ;;  %s2776_s11 = smov 96   ;;  %vm272_vm2 = vcmask 523264  }
   0xa   :  { %2381 = vmatpush3.bf16.msra.mxu0 %v2627_v14  ;;  %2384 = vmatprep.mubr.msk.bf16.mxu0 %vm2774_vm1, %v2773_v15  ;;  %v2853_v20 = vld [vmem:[%s3449_s2 + $0x128] sm:$0xff]   ;;  %v2198_v29 = vld [vmem:[%s3450_s3] ss:$0 sm:$0xff]  ;;  %v2199_v33 = vld [vmem:[%s3450_s3 + $0x1] ss:$0 sm:$0xff]  ;;  %vm1456_vm3 = vcmask 1040384  }
   0xb   :  { %2382 = vmatprep.subr.bf16.mxu0 %v2773_v15  ;;  %2396 = vmatprep.mubr.msk.bf16.mxu1 %vm2774_vm1, %v2773_v15  ;;  %v2200_v39 = vld [vmem:[%s3450_s3 + $0x2] ss:$0 sm:$0xff]  ;;  %v2917_v3 = vld [vmem:[%s3448_s1 + $0x8] sm:$0xff]  ;;  %vm2169_vm4 = vcmask 25600   ;;  %vm2181_vm5 = vcmask 31744  }
   0xc   :  { %v2912_v63 = vld [vmem:[%s3448_s1] sm:$0xff]  ;;  %s2777_s1 = smov 64  }
   0xe   :  { %2383 = vmatpush3.bf16.msra.mxu0 %v2628_v16 }
   0xf   :  { %2400 = vmatprep.subr.bf16.mxu0 %v2773_v15 }
  0x1d   :  { %168 = vrot.lane.b32.xlu0 %v2837_v18, %s2775_s26 }
  0x90   :  { %v44_v4 = vpop.xlane.xlu0 %43 }
  0x91   :  { %v49_v5 = vmul.f32 0.03125, %v44_v4 }
  0x93   :  { %v51_v6 = vsub.f32 %v37_v0, %v49_v5 }
  0x94   :  { %v47_v7 = vpop.xlane.xlu0 %46 }
  0x95   :  { %v50_v8 = vmul.f32 0.03125, %v47_v7  ;;  %v53_v9 = vmul.f32 %v51_v6, %v51_v6 }
  0x97   :  { %v52_v10 = vsub.f32 %v38_v1, %v50_v8  ;;  %v55_v11 = vsel %vm41_vm0, %v53_v9, 0.0 }
  0x98   :  { %56 = vadd.xlane.f32.xlu1 %v55_v11  ;;  %v2879_v47 = vpop.permute.xlu0 %168  ;;  %v2935_v11 = vld [vmem:[%s3449_s2 + $0x138] sm:$0xff]  }
  0x99   :  { %v54_v12 = vmul.f32 %v52_v10, %v52_v10 }
  0x9b   :  { %v58_v13 = vsel %vm41_vm0, %v54_v12, 0.0  ;;  %v2946_v12 = vld [vmem:[%s3449_s2 + $0x140] sm:$0xff]  }
  0x9c   :  { %59 = vadd.xlane.f32.xlu1 %v58_v13  ;;  %v2954_v13 = vld [vmem:[%s3449_s2 + $0x148] sm:$0xff]  }
  0xad   :  { %170 = vrot.lane.b32.xlu1 %v2832_v17, %s2775_s26 }
  0xb1   :  { %172 = vrot.lane.b32.xlu1 %v2844_v19, %s2775_s26 }
  0xb5   :  { %174 = vrot.lane.b32.xlu1 %v2853_v20, %s2775_s26 }
 0x125   :  { %v57_v21 = vpop.xlane.xlu1 %56 }
 0x126   :  { %v61_v22 = vmul.f32 0.03125, %v57_v21 }
 0x128   :  { %v63_v23 = vadd.f32 1e-12, %v61_v22 }
 0x129   :  { %v60_v24 = vpop.xlane.xlu1 %59 }
 0x12a   :  { %2669 = vrsqrt.f32 %v63_v23  ;;  %v62_v25 = vmul.f32 0.03125, %v60_v24 }
 0x12c   :  { %v64_v26 = vadd.f32 1e-12, %v62_v25 }
 0x12d   :  { %v2872_v38 = vpop.permute.xlu1 %170 }
 0x12e   :  { %2671 = vrsqrt.f32 %v64_v26 }
 0x131   :  { %v2877_v43 = vpop.permute.xlu1 %172 }
 0x134   :  { %v2670_v27 = vpop.eup %2669 }
 0x135   :  { %v67_v28 = vmul.f32 %v2670_v27, %v51_v6  ;;  %v2887_v51 = vpop.permute.xlu1 %174 }
 0x137   :  { %v73_v32 = vmul.f32 %v2198_v29, %v67_v28 }
 0x138   :  { %v2672_v30 = vpop.eup %2671 }
 0x139   :  { %v68_v31 = vmul.f32 %v2672_v30, %v52_v10  ;;  %v2863_v35 = vadd.f32 %v2199_v33, %v73_v32  ;;  %v2926_v10 = vld [vmem:[%s3449_s2 + $0x130] sm:$0xff]  }
 0x13b   :  { %v74_v34 = vmul.f32 %v2198_v29, %v68_v31 }
 0x13d   :  { %v2865_v36 = vadd.f32 %v2199_v33, %v74_v34  ;;  %v2637_v33 = vld [vmem:[%s3449_s2 + $0x10] sm:$0xff]  }
 0x13f   :  { %v81_v37 = vpack.c.bf16 %v2865_v36, %v2863_v35 }
 0x141   :  { %2385 = vmatmul.mubr.msk.bf16.vlgmr.msra.gmra.mrb[0].mxu0 %vm41_vm0, %v81_v37 }
 0x142   :  { %2408 = vmatprep.mubr.msk.bf16.mxu0 %vm2774_vm1, %v2773_v15  ;;  %2401 = vmatpush3.bf16.msra.mxu0 %v2926_v10 }
 0x143   :  { %2402 = vmatprep.subr.bf16.mxu0 %v2773_v15 }
 0x146   :  { %2403 = vmatpush3.bf16.msra.mxu0 %v2935_v11 }
 0x147   :  { %2404 = vmatprep.subr.bf16.mxu0 %v2773_v15 }
 0x14a   :  { %2405 = vmatpush3.bf16.msra.mxu0 %v2946_v12 }
 0x14b   :  { %2406 = vmatprep.subr.bf16.mxu0 %v2773_v15 }
 0x14e   :  { %2407 = vmatpush3.bf16.msra.mxu0 %v2954_v13 }
 0x14f   :  { %2412 = vmatprep.subr.bf16.mxu0 %v2773_v15 }
 0x214   :  { %v140_v40 = vpop.f32.mrb[0].mxu0 }
 0x215   :  { %v2386_v41 = vpop.f32.mrb[1].mxu0  ;;  %v141_v44 = vadd.f32 %v2200_v39, %v140_v40 }
 0x216   :  { %v143_v42 = vpop.f32.mrb[2].mxu0 }
 0x217   :  { %v144_v45 = vadd.f32 %v2200_v39, %v143_v42  ;;  %v2387_v46 = vpop.f32.mrb[3].mxu0 }
 0x219   :  { %v2881_v48 = vpack.c.bf16 %v144_v45, %v141_v44 }
 0x21b   :  { %v180_v49 = vmul.bf16 %v2879_v47, %v2881_v48  ;;  %v181_v50 = vmul.bf16 %v2872_v38, %v2881_v48  ;;  %v182_v52 = vmul.bf16 %v2877_v43, %v2881_v48  ;;  %v183_v53 = vmul.bf16 %v2887_v51, %v2881_v48 }
 0x21d   :  { %206 = vrot.lane.b32.xlu1 %v181_v50, %s2776_s11  ;;  %204 = vrot.lane.b32.xlu0 %v180_v49, %s2776_s11 }
 0x221   :  { %210 = vrot.lane.b32.xlu1 %v183_v53, %s2776_s11  ;;  %208 = vrot.lane.b32.xlu0 %v182_v52, %s2776_s11 }
 0x28f   :  { %v205_v54 = vpop.permute.xlu0 %204  ;;  %v207_v56 = vpop.permute.xlu1 %206 }
 0x290   :  { %v216_v55 = vsel %vm41_vm0, %v205_v54, 0  ;;  %v219_v57 = vsel %vm41_vm0, %v207_v56, 0  ;;  %v2638_v54 = vld [vmem:[%s3449_s2 + $0x18] sm:$0xff]  }
 0x291   :  { %2389 = vmatpush3.bf16.xpose.msra.mxu1 %v216_v55 }
 0x292   :  { %2390 = vmatprep.subr.bf16.mxu1 %v2773_v15 }
 0x293   :  { %v209_v58 = vpop.permute.xlu0 %208  ;;  %v211_v60 = vpop.permute.xlu1 %210 }
 0x294   :  { %v222_v59 = vsel %vm41_vm0, %v209_v58, 0  ;;  %v225_v61 = vsel %vm41_vm0, %v211_v60, 0  ;;  %v2215_v60 = vld [vmem:[%s3450_s3 + $0x3] ss:$0 sm:$0xff] }
 0x299   :  { %2391 = vmatpush3.bf16.xpose.msra.mxu1 %v219_v57 }
 0x29a   :  { %2392 = vmatprep.subr.bf16.mxu1 %v2773_v15 }
 0x2a1   :  { %2393 = vmatpush3.bf16.xpose.msra.mxu1 %v222_v59 }
 0x2a2   :  { %2394 = vmatprep.subr.bf16.mxu1 %v2773_v15 }
 0x2a9   :  { %2395 = vmatpush3.bf16.xpose.msra.mxu1 %v225_v61 }
 0x2aa   :  { %2424 = vmatprep.subr.bf16.mxu1 %v2773_v15 }
 0x2b0   :  { %2397 = vmatmul.mubr.msk.bf16.vlgmr.msra.gmra.mrb[0].mxu1 %vm41_vm0, %v2881_v48 }
 0x2b1   :  { %2428 = vmatprep.mubr.msk.bf16.mxu1 %vm2774_vm1, %v2773_v15  ;;  %2425 = vmatpush3.bf16.msra.mxu1 %v2637_v33 }
 0x2b2   :  { %2426 = vmatprep.subr.bf16.mxu1 %v2773_v15 }
 0x2b5   :  { %2427 = vmatpush3.bf16.msra.mxu1 %v2638_v54  ;;  %v2644_v54 = vld [vmem:[%s3449_s2 + $0x48] sm:$0xff]  }
 0x2b6   :  { %2440 = vmatprep.subr.bf16.mxu1 %v2773_v15 }
 0x383   :  { %v261_v62 = vpop.f32.mrb[0].mxu1 }
 0x384   :  { %v268_v0 = vmul.f32 0.35355338, %v261_v62  ;;  %v2398_v1 = vpop.f32.mrb[1].mxu1 }
 0x385   :  { %v264_v2 = vpop.f32.mrb[2].mxu1 }
 0x386   :  { %v269_v4 = vmul.f32 0.35355338, %v264_v2  ;;  %v2399_v5 = vpop.f32.mrb[3].mxu1  ;;  %v270_v6 = vadd.f32 %v268_v0, %v2912_v63 }
 0x388   :  { %v273_v7 = vsel %vm272_vm2, %v270_v6, -inf  ;;  %v271_v8 = vadd.f32 %v269_v4, %v2917_v3 }
 0x389   :  { %274 = vmax.xlane.f32.xlu0 %v273_v7 }
 0x38a   :  { %v276_v9 = vsel %vm272_vm2, %v271_v8, -inf }
 0x38b   :  { %277 = vmax.xlane.f32.xlu1 %v276_v9 }
 0x39c   :  { %186 = vrot.lane.b32.xlu1 %v2832_v17, %s2777_s1 }
 0x39f   :  { %184 = vrot.lane.b32.xlu0 %v2837_v18, %s2777_s1 }
 0x3a0   :  { %190 = vrot.lane.b32.xlu1 %v2853_v20, %s2777_s1 }
 0x3a3   :  { %188 = vrot.lane.b32.xlu0 %v2844_v19, %s2777_s1 }
 0x416   :  { %v275_v14 = vpop.xlane.xlu0 %274 }
 0x417   :  { %v279_v16 = vsub.f32 %v270_v6, %v275_v14 }
 0x418   :  { %v278_v17 = vpop.xlane.xlu1 %277 }
 0x419   :  { %v281_v18 = vmul.f32 1.442695, %v279_v16  ;;  %v280_v20 = vsub.f32 %v271_v8, %v278_v17 }
 0x41a   :  { %v2959_v21 = vpop.permute.xlu0 %184 }
 0x41b   :  { %v283_v19 = vmul.f32 1.442695, %v280_v20  ;;  %v196_v22 = vmul.bf16 %v2959_v21, %v2881_v48  ;;  %2673 = vpow2.f32 %v281_v18 }
 0x41c   :  { %v2963_v23 = vpop.permute.xlu1 %186 }
 0x41d   :  { %2675 = vpow2.f32 %v283_v19  ;;  %v197_v24 = vmul.bf16 %v2963_v23, %v2881_v48  ;;  %365 = vrot.lane.b32.xlu0 %v196_v22, %s2777_s1 }
 0x41e   :  { %v2968_v25 = vpop.permute.xlu0 %188 }
 0x41f   :  { %v198_v26 = vmul.bf16 %v2968_v25, %v2881_v48  ;;  %367 = vrot.lane.b32.xlu1 %v197_v24, %s2777_s1 }
 0x420   :  { %v2973_v27 = vpop.permute.xlu1 %190 }
 0x421   :  { %v199_v28 = vmul.bf16 %v2973_v27, %v2881_v48  ;;  %369 = vrot.lane.b32.xlu0 %v198_v26, %s2777_s1  ;;  %v2640_v26 = vld [vmem:[%s3449_s2 + $0x28] sm:$0xff]  }
 0x423   :  { %371 = vrot.lane.b32.xlu1 %v199_v28, %s2777_s1 }
 0x425   :  { %v2674_v29 = vpop.eup %2673 }
 0x427   :  { %v2676_v30 = vpop.eup %2675 }
 0x428   :  { %v285_v31 = vpack.c.bf16 %v2676_v30, %v2674_v29 }
 0x42a   :  { %2409 = vmatmul.mubr.msk.bf16.vlgmr.msra.gmra.mrb[4].mxu0 %vm272_vm2, %v285_v31 }
 0x42b   :  { %2420 = vmatprep.mubr.msk.bf16.mxu0 %vm2774_vm1, %v2773_v15 }
 0x48f   :  { %v366_v32 = vpop.permute.xlu0 %365 }
 0x490   :  { %2413 = vmatpush3.bf16.msra.mxu0 %v366_v32 }
 0x491   :  { %2414 = vmatprep.subr.bf16.mxu0 %v2773_v15  ;;  %v368_v34 = vpop.permute.xlu1 %367 }
 0x493   :  { %v370_v37 = vpop.permute.xlu0 %369 }
 0x494   :  { %2415 = vmatpush3.bf16.msra.mxu0 %v368_v34 }
 0x495   :  { %2416 = vmatprep.subr.bf16.mxu0 %v2773_v15  ;;  %v372_v39 = vpop.permute.xlu1 %371 }
 0x498   :  { %2417 = vmatpush3.bf16.msra.mxu0 %v370_v37 }
 0x499   :  { %2418 = vmatprep.subr.bf16.mxu0 %v2773_v15 }
 0x49c   :  { %2419 = vmatpush3.bf16.msra.mxu0 %v372_v39  ;;  %v2219_v39 = vld [vmem:[%s3450_s3 + $0x4] ss:$0 sm:$0xff] }
 0x49d   :  { %2432 = vmatprep.subr.bf16.mxu0 %v2773_v15 }
 0x4fd   :  { %v347_v40 = vpop.f32.mrb[4].mxu0 }
 0x4fe   :  { %v354_v41 = vmax.f32 %v347_v40, 1e-20  ;;  %v2410_v42 = vpop.f32.mrb[5].mxu0 }
 0x4ff   :  { %v350_v44 = vpop.f32.mrb[6].mxu0 }
 0x500   :  { %2677 = vrcp.f32 %v354_v41  ;;  %v355_v45 = vmax.f32 %v350_v44, 1e-20  ;;  %v2411_v46 = vpop.f32.mrb[7].mxu0  ;;  %v2220_v44 = vld [vmem:[%s3450_s3 + $0x5] ss:$0 sm:$0xff] }
 0x502   :  { %2679 = vrcp.f32 %v355_v45 }
 0x50a   :  { %v2678_v48 = vpop.eup %2677 }
 0x50b   :  { %v358_v50 = vmul.f32 %v2678_v48, %v2674_v29 }
 0x50c   :  { %v2680_v49 = vpop.eup %2679 }
 0x50d   :  { %v359_v52 = vmul.f32 %v2680_v49, %v2676_v30 }
 0x50f   :  { %v360_v53 = vpack.c.bf16 %v359_v52, %v358_v50  ;;  %v2641_v50 = vld [vmem:[%s3449_s2 + $0x30] sm:$0xff]   ;;  %v2642_v52 = vld [vmem:[%s3449_s2 + $0x38] sm:$0xff]  }
 0x511   :  { %2421 = vmatmul.mubr.msk.bf16.vlgmr.msra.gmra.mrb[8].mxu0 %vm272_vm2, %v360_v53  ;;  %v2643_v53 = vld [vmem:[%s3449_s2 + $0x40] sm:$0xff]  }
 0x512   :  { %2436 = vmatprep.mubr.msk.bf16.mxu0 %vm2774_vm1, %v2773_v15 }
 0x5e4   :  { %v414_v55 = vpop.f32.mrb[8].mxu0 }
 0x5e5   :  { %v2422_v56 = vpop.f32.mrb[9].mxu0 }
 0x5e6   :  { %v417_v57 = vpop.f32.mrb[10].mxu0  ;;  %v2646_v56 = vld [vmem:[%s3449_s2 + $0x58] sm:$0xff]  }
 0x5e7   :  { %v421_v58 = vpack.c.bf16 %v417_v57, %v414_v55  ;;  %v2423_v59 = vpop.f32.mrb[11].mxu0  ;;  %v2645_v55 = vld [vmem:[%s3449_s2 + $0x50] sm:$0xff]   ;;  %v2647_v57 = vld [vmem:[%s3449_s2 + $0x60] sm:$0xff]  }
 0x5e8   :  { %v2221_v59 = vld [vmem:[%s3450_s3 + $0x6] ss:$0 sm:$0xff] }
 0x5e9   :  { %2429 = vmatmul.mubr.msk.bf16.vlgmr.msra.gmra.mrb[4].mxu1 %vm41_vm0, %v421_v58  ;;  %v2648_v58 = vld [vmem:[%s3449_s2 + $0x68] sm:$0xff]  }
 0x5ea   :  { %2456 = vmatprep.mubr.msk.bf16.mxu1 %vm2774_vm1, %v2773_v15  ;;  %2441 = vmatpush3.bf16.msra.mxu1 %v2641_v50 }
 0x5eb   :  { %2442 = vmatprep.subr.bf16.mxu1 %v2773_v15 }
 0x5ee   :  { %2443 = vmatpush3.bf16.msra.mxu1 %v2642_v52 }
 0x5ef   :  { %2444 = vmatprep.subr.bf16.mxu1 %v2773_v15 }
 0x5f2   :  { %2445 = vmatpush3.bf16.msra.mxu1 %v2643_v53 }
 0x5f3   :  { %2446 = vmatprep.subr.bf16.mxu1 %v2773_v15 }
 0x5f6   :  { %2447 = vmatpush3.bf16.msra.mxu1 %v2644_v54  ;;  %v2650_v54 = vld [vmem:[%s3449_s2 + $0x78] sm:$0xff]  }
 0x5f7   :  { %2448 = vmatprep.subr.bf16.mxu1 %v2773_v15 }
 0x5fa   :  { %2449 = vmatpush3.bf16.msra.mxu1 %v2645_v55 }
 0x5fb   :  { %2450 = vmatprep.subr.bf16.mxu1 %v2773_v15 }
 0x5fe   :  { %2451 = vmatpush3.bf16.msra.mxu1 %v2646_v56 }
 0x5ff   :  { %2452 = vmatprep.subr.bf16.mxu1 %v2773_v15 }
 0x602   :  { %2453 = vmatpush3.bf16.msra.mxu1 %v2647_v57 }
 0x603   :  { %2454 = vmatprep.subr.bf16.mxu1 %v2773_v15 }
 0x606   :  { %2455 = vmatpush3.bf16.msra.mxu1 %v2648_v58 }
 0x607   :  { %2480 = vmatprep.subr.bf16.mxu1 %v2773_v15 }
 0x6bc   :  { %v480_v61 = vpop.f32.mrb[4].mxu1 }
 0x6bd   :  { %v481_v62 = vadd.f32 %v2215_v60, %v480_v61  ;;  %v2430_v0 = vpop.f32.mrb[5].mxu1 }
 0x6be   :  { %v483_v1 = vpop.f32.mrb[6].mxu1 }
 0x6bf   :  { %v484_v2 = vadd.f32 %v2215_v60, %v483_v1  ;;  %v2431_v4 = vpop.f32.mrb[7].mxu1  ;;  %v487_v5 = vadd.f32 %v481_v62, %v2863_v35 }
 0x6c1   :  { %v491_v6 = vsel %vm41_vm0, %v487_v5, 0.0  ;;  %v488_v7 = vadd.f32 %v484_v2, %v2865_v36  ;;  %v2639_v36 = vld [vmem:[%s3449_s2 + $0x20] sm:$0xff]  }
 0x6c2   :  { %492 = vadd.xlane.f32.xlu0 %v491_v6  ;;  %2433 = vmatpush3.bf16.msra.mxu0 %v2639_v36 }
 0x6c3   :  { %v494_v8 = vsel %vm41_vm0, %v488_v7, 0.0  ;;  %2434 = vmatprep.subr.bf16.mxu0 %v2773_v15 }
 0x6c4   :  { %495 = vadd.xlane.f32.xlu1 %v494_v8 }
 0x6c6   :  { %2435 = vmatpush3.bf16.msra.mxu0 %v2640_v26 }
 0x6c7   :  { %2460 = vmatprep.subr.bf16.mxu0 %v2773_v15 }
 0x74f   :  { %v493_v9 = vpop.xlane.xlu0 %492 }
 0x750   :  { %v497_v14 = vmul.f32 0.03125, %v493_v9 }
 0x751   :  { %v496_v16 = vpop.xlane.xlu1 %495 }
 0x752   :  { %v499_v17 = vsub.f32 %v487_v5, %v497_v14  ;;  %v498_v18 = vmul.f32 0.03125, %v496_v16 }
 0x754   :  { %v500_v20 = vsub.f32 %v488_v7, %v498_v18  ;;  %v501_v19 = vmul.f32 %v499_v17, %v499_v17 }
 0x756   :  { %v503_v22 = vsel %vm41_vm0, %v501_v19, 0.0  ;;  %v502_v24 = vmul.f32 %v500_v20, %v500_v20 }
 0x757   :  { %504 = vadd.xlane.f32.xlu0 %v503_v22 }
 0x758   :  { %v506_v35 = vsel %vm41_vm0, %v502_v24, 0.0 }
 0x75b   :  { %507 = vadd.xlane.f32.xlu0 %v506_v35 }
 0x7e4   :  { %v505_v28 = vpop.xlane.xlu0 %504 }
 0x7e5   :  { %v509_v29 = vmul.f32 0.03125, %v505_v28 }
 0x7e7   :  { %v511_v30 = vadd.f32 1e-12, %v509_v29 }
 0x7e8   :  { %v508_v31 = vpop.xlane.xlu0 %507 }
 0x7e9   :  { %2681 = vrsqrt.f32 %v511_v30  ;;  %v510_v32 = vmul.f32 0.03125, %v508_v31 }
 0x7eb   :  { %v512_v33 = vadd.f32 1e-12, %v510_v32 }
 0x7ed   :  { %2683 = vrsqrt.f32 %v512_v33 }
 0x7f3   :  { %v2682_v34 = vpop.eup %2681 }
 0x7f4   :  { %v515_v37 = vmul.f32 %v2682_v34, %v499_v17 }
 0x7f6   :  { %v521_v41 = vmul.f32 %v2219_v39, %v515_v37 }
 0x7f7   :  { %v2684_v40 = vpop.eup %2683 }
 0x7f8   :  { %v516_v42 = vmul.f32 %v2684_v40, %v500_v20  ;;  %v3023_v46 = vadd.f32 %v2220_v44, %v521_v41 }
 0x7fa   :  { %v522_v45 = vmul.f32 %v2219_v39, %v516_v42 }
 0x7fc   :  { %v3025_v48 = vadd.f32 %v2220_v44, %v522_v45 }
 0x7fe   :  { %v529_v49 = vpack.c.bf16 %v3025_v48, %v3023_v46 }
 0x800   :  { %2437 = vmatmul.mubr.msk.bf16.vlgmr.msra.gmra.mrb[12].mxu0 %vm41_vm0, %v529_v49 }
 0x801   :  { %2464 = vmatprep.mubr.msk.bf16.mxu0 %vm2774_vm1, %v2773_v15 }
 0x8d3   :  { %v588_v60 = vpop.f32.mrb[12].mxu0 }
 0x8d4   :  { %v589_v61 = vadd.f32 %v2221_v59, %v588_v60  ;;  %v2438_v62 = vpop.f32.mrb[13].mxu0 }
 0x8d5   :  { %v591_v0 = vpop.f32.mrb[14].mxu0  ;;  %v2234_v62 = vld [vmem:[%s3450_s3 + $0x8] ss:$0 sm:$0xff] }
 0x8d6   :  { %v595_v1 = vmul.f32 %v589_v61, %v589_v61  ;;  %v592_v2 = vadd.f32 %v2221_v59, %v591_v0  ;;  %v2439_v4 = vpop.f32.mrb[15].mxu0 }
 0x8d8   :  { %v597_v5 = vmul.f32 %v595_v1, %v589_v61  ;;  %v596_v6 = vmul.f32 %v592_v2, %v592_v2 }
 0x8da   :  { %v599_v7 = vmul.f32 0.044715, %v597_v5  ;;  %v598_v8 = vmul.f32 %v596_v6, %v592_v2  ;;  %v2235_v5 = vld [vmem:[%s3450_s3 + $0x9] ss:$0 sm:$0xff] }
 0x8dc   :  { %v601_v9 = vadd.f32 %v599_v7, %v589_v61  ;;  %v600_v14 = vmul.f32 0.044715, %v598_v8 }
 0x8de   :  { %v603_v16 = vmul.f32 0.7978846, %v601_v9  ;;  %v602_v17 = vadd.f32 %v600_v14, %v592_v2  ;;  %v2236_v14 = vld [vmem:[%s3450_s3 + $0xa] ss:$0 sm:$0xff] }
 0x8e0   :  { %2685 = vtanh.f32 %v603_v16  ;;  %v604_v18 = vmul.f32 0.7978846, %v602_v17 }
 0x8e2   :  { %2687 = vtanh.f32 %v604_v18 }
 0x8ea   :  { %v2686_v20 = vpop.eup %2685 }
 0x8eb   :  { %v607_v19 = vadd.f32 1.0, %v2686_v20 }
 0x8ec   :  { %v2688_v22 = vpop.eup %2687 }
 0x8ed   :  { %v609_v24 = vmul.f32 0.5, %v607_v19  ;;  %v608_v35 = vadd.f32 1.0, %v2688_v22 }
 0x8ef   :  { %v610_v36 = vmul.f32 0.5, %v608_v35  ;;  %v611_v26 = vmul.f32 %v609_v24, %v589_v61 }
 0x8f1   :  { %v612_v28 = vmul.f32 %v610_v36, %v592_v2 }
 0x8f3   :  { %v613_v29 = vpack.c.bf16 %v612_v28, %v611_v26 }
 0x8f5   :  { %2457 = vmatmul.mubr.bf16.vlgmr.msra.gmra.mrb[8].mxu1 %v613_v29 }
 0x8f6   :  { %2481 = vmatpush3.bf16.msra.mxu1 %v2926_v10  ;;  %2488 = vmatprep.mubr.msk.bf16.mxu1 %vm2774_vm1, %v2773_v15  ;;  %v2225_v10 = vld [vmem:[%s3450_s3 + $0x7] ss:$0 sm:$0xff] }
 0x8f7   :  { %2482 = vmatprep.subr.bf16.mxu1 %v2773_v15 }
 0x8fa   :  { %2483 = vmatpush3.bf16.msra.mxu1 %v2935_v11 }
 0x8fb   :  { %2484 = vmatprep.subr.bf16.mxu1 %v2773_v15 }
 0x8fe   :  { %2485 = vmatpush3.bf16.msra.mxu1 %v2946_v12 }
 0x8ff   :  { %2486 = vmatprep.subr.bf16.mxu1 %v2773_v15 }
 0x902   :  { %2487 = vmatpush3.bf16.msra.mxu1 %v2954_v13 }
 0x903   :  { %2504 = vmatprep.subr.bf16.mxu1 %v2773_v15 }
 0x9c8   :  { %v717_v30 = vpop.f32.mrb[8].mxu1 }
 0x9c9   :  { %v718_v31 = vadd.f32 %v2225_v10, %v717_v30  ;;  %v2458_v32 = vpop.f32.mrb[9].mxu1 }
 0x9ca   :  { %v720_v33 = vpop.f32.mrb[10].mxu1 }
 0x9cb   :  { %v721_v34 = vadd.f32 %v2225_v10, %v720_v33  ;;  %v2459_v11 = vpop.f32.mrb[11].mxu1  ;;  %v724_v37 = vadd.f32 %v718_v31, %v3023_v46 }
 0x9cd   :  { %v728_v12 = vsel %vm41_vm0, %v724_v37, 0.0  ;;  %v725_v39 = vadd.f32 %v721_v34, %v3025_v48  ;;  %v2649_v48 = vld [vmem:[%s3449_s2 + $0x70] sm:$0xff]  }
 0x9ce   :  { %729 = vadd.xlane.f32.xlu0 %v728_v12  ;;  %2461 = vmatpush3.bf16.msra.mxu0 %v2649_v48 }
 0x9cf   :  { %v731_v13 = vsel %vm41_vm0, %v725_v39, 0.0  ;;  %2462 = vmatprep.subr.bf16.mxu0 %v2773_v15 }
 0x9d0   :  { %732 = vadd.xlane.f32.xlu1 %v731_v13 }
 0x9d2   :  { %2463 = vmatpush3.bf16.msra.mxu0 %v2650_v54 }
 0x9d3   :  { %2468 = vmatprep.subr.bf16.mxu0 %v2773_v15 }
 0xa5b   :  { %v730_v40 = vpop.xlane.xlu0 %729 }
 0xa5c   :  { %v734_v41 = vmul.f32 0.03125, %v730_v40 }
 0xa5d   :  { %v733_v42 = vpop.xlane.xlu1 %732 }
 0xa5e   :  { %v736_v44 = vsub.f32 %v724_v37, %v734_v41  ;;  %v735_v45 = vmul.f32 0.03125, %v733_v42 }
 0xa60   :  { %v737_v49 = vsub.f32 %v725_v39, %v735_v45  ;;  %v738_v50 = vmul.f32 %v736_v44, %v736_v44 }
 0xa62   :  { %v740_v52 = vsel %vm41_vm0, %v738_v50, 0.0  ;;  %v739_v53 = vmul.f32 %v737_v49, %v737_v49 }
 0xa63   :  { %741 = vadd.xlane.f32.xlu0 %v740_v52 }
 0xa64   :  { %v743_v46 = vsel %vm41_vm0, %v739_v53, 0.0 }
 0xa65   :  { %744 = vadd.xlane.f32.xlu1 %v743_v46 }
 0xaf0   :  { %v742_v55 = vpop.xlane.xlu0 %741 }
 0xaf1   :  { %v746_v56 = vmul.f32 0.03125, %v742_v55 }
 0xaf2   :  { %v745_v57 = vpop.xlane.xlu1 %744 }
 0xaf3   :  { %v748_v58 = vadd.f32 1e-12, %v746_v56  ;;  %v747_v59 = vmul.f32 0.03125, %v745_v57  ;;  %v2651_v56 = vld [vmem:[%s3449_s2 + $0x80] sm:$0xff]  }
 0xaf5   :  { %2689 = vrsqrt.f32 %v748_v58  ;;  %v749_v60 = vadd.f32 1e-12, %v747_v59 }
 0xaf7   :  { %2691 = vrsqrt.f32 %v749_v60 }
 0xaff   :  { %v2690_v61 = vpop.eup %2689 }
 0xb00   :  { %v752_v0 = vmul.f32 %v2690_v61, %v736_v44 }
 0xb01   :  { %v2692_v1 = vpop.eup %2691 }
 0xb02   :  { %v758_v2 = vmul.f32 %v2234_v62, %v752_v0  ;;  %v753_v4 = vmul.f32 %v2692_v1, %v737_v49 }
 0xb04   :  { %v759_v6 = vmul.f32 %v2234_v62, %v753_v4  ;;  %v3100_v7 = vadd.f32 %v2235_v5, %v758_v2 }
 0xb06   :  { %v3102_v8 = vadd.f32 %v2235_v5, %v759_v6  ;;  %v2652_v6 = vld [vmem:[%s3449_s2 + $0x88] sm:$0xff]  }
 0xb08   :  { %v766_v9 = vpack.c.bf16 %v3102_v8, %v3100_v7 }
 0xb0a   :  { %2465 = vmatmul.mubr.msk.bf16.vlgmr.msra.gmra.mrb[16].mxu0 %vm41_vm0, %v766_v9 }
 0xb0b   :  { %2476 = vmatprep.mubr.msk.bf16.mxu0 %vm2774_vm1, %v2773_v15 }
 0xbdd   :  { %v825_v16 = vpop.f32.mrb[16].mxu0 }
 0xbde   :  { %v2466_v17 = vpop.f32.mrb[17].mxu0  ;;  %v826_v20 = vadd.f32 %v2236_v14, %v825_v16 }
 0xbdf   :  { %v828_v18 = vpop.f32.mrb[18].mxu0 }
 0xbe0   :  { %v829_v19 = vadd.f32 %v2236_v14, %v828_v18  ;;  %v2467_v22 = vpop.f32.mrb[19].mxu0 }
 0xbe2   :  { %v832_v24 = vpack.c.bf16 %v829_v19, %v826_v20  ;;  %v2243_v20 = vld [vmem:[%s3450_s3 + $0xb] ss:$0 sm:$0xff] }
 0xbe4   :  { %v834_v35 = vmul.bf16 %v832_v24, %v2872_v38  ;;  %v833_v36 = vmul.bf16 %v832_v24, %v2879_v47  ;;  %v835_v26 = vmul.bf16 %v832_v24, %v2877_v43  ;;  %v836_v28 = vmul.bf16 %v832_v24, %v2887_v51 }
 0xbe5   :  { %v838_v42 = vmul.bf16 %v832_v24, %v2963_v23  ;;  %v837_v44 = vmul.bf16 %v832_v24, %v2959_v21  ;;  %v840_v45 = vmul.bf16 %v832_v24, %v2973_v27 }
 0xbe6   :  { %847 = vrot.lane.b32.xlu1 %v834_v35, %s2776_s11  ;;  %845 = vrot.lane.b32.xlu0 %v833_v36, %s2776_s11 }
 0xbea   :  { %849 = vrot.lane.b32.xlu1 %v835_v26, %s2776_s11 }
 0xbee   :  { %851 = vrot.lane.b32.xlu1 %v836_v28, %s2776_s11 }
 0xc58   :  { %v846_v29 = vpop.permute.xlu0 %845  ;;  %v848_v38 = vpop.permute.xlu1 %847 }
 0xc59   :  { %v857_v10 = vsel %vm41_vm0, %v846_v29, 0  ;;  %v860_v47 = vsel %vm41_vm0, %v848_v38, 0 }
 0xc5a   :  { %2469 = vmatpush3.bf16.xpose.msra.mxu0 %v857_v10 }
 0xc5b   :  { %2470 = vmatprep.subr.bf16.mxu0 %v2773_v15 }
 0xc5c   :  { %v850_v30 = vpop.permute.xlu1 %849 }
 0xc5d   :  { %v863_v43 = vsel %vm41_vm0, %v850_v30, 0 }
 0xc60   :  { %v852_v51 = vpop.permute.xlu1 %851 }
 0xc61   :  { %v866_v31 = vsel %vm41_vm0, %v852_v51, 0 }
 0xc62   :  { %2471 = vmatpush3.bf16.xpose.msra.mxu0 %v860_v47 }
 0xc63   :  { %2472 = vmatprep.subr.bf16.mxu0 %v2773_v15 }
 0xc6a   :  { %2473 = vmatpush3.bf16.xpose.msra.mxu0 %v863_v43 }
 0xc6b   :  { %2474 = vmatprep.subr.bf16.mxu0 %v2773_v15 }
 0xc72   :  { %2475 = vmatpush3.bf16.xpose.msra.mxu0 %v866_v31 }
 0xc73   :  { %2492 = vmatprep.subr.bf16.mxu0 %v2773_v15 }
 0xc79   :  { %2477 = vmatmul.mubr.msk.bf16.vlgmr.msra.gmra.mrb[20].mxu0 %vm41_vm0, %v832_v24 }
 0xc7a   :  { %2500 = vmatprep.mubr.msk.bf16.mxu0 %vm2774_vm1, %v2773_v15 }
 0xd4c   :  { %v902_v32 = vpop.f32.mrb[20].mxu0 }
 0xd4d   :  { %v909_v33 = vmul.f32 0.35355338, %v902_v32  ;;  %v2478_v34 = vpop.f32.mrb[21].mxu0 }
 0xd4e   :  { %v905_v11 = vpop.f32.mrb[22].mxu0 }
 0xd4f   :  { %v910_v37 = vmul.f32 0.35355338, %v905_v11  ;;  %v2479_v12 = vpop.f32.mrb[23].mxu0  ;;  %v911_v39 = vadd.f32 %v909_v33, %v2912_v63  ;;  %v839_v63 = vmul.bf16 %v832_v24, %v2968_v25 }
 0xd51   :  { %v913_v13 = vsel %vm272_vm2, %v911_v39, -inf  ;;  %v912_v40 = vadd.f32 %v910_v37, %v2917_v3  ;;  %v2654_v37 = vld [vmem:[%s3449_s2 + $0x98] sm:$0xff]  }
 0xd52   :  { %914 = vmax.xlane.f32.xlu0 %v913_v13 }
 0xd53   :  { %v916_v41 = vsel %vm272_vm2, %v912_v40, -inf }
 0xd54   :  { %917 = vmax.xlane.f32.xlu1 %v916_v41 }
 0xd65   :  { %983 = vrot.lane.b32.xlu1 %v838_v42, %s2777_s1 }
 0xd68   :  { %981 = vrot.lane.b32.xlu0 %v837_v44, %s2777_s1 }
 0xd69   :  { %987 = vrot.lane.b32.xlu1 %v840_v45, %s2777_s1 }
 0xd6c   :  { %985 = vrot.lane.b32.xlu0 %v839_v63, %s2777_s1  ;;  %v2247_v63 = vld [vmem:[%s3450_s3 + $0xc] ss:$0 sm:$0xff] }
 0xddf   :  { %v915_v3 = vpop.xlane.xlu0 %914 }
 0xde0   :  { %v919_v49 = vsub.f32 %v911_v39, %v915_v3 }
 0xde1   :  { %v918_v50 = vpop.xlane.xlu1 %917 }
 0xde2   :  { %v921_v52 = vmul.f32 1.442695, %v919_v49  ;;  %v920_v53 = vsub.f32 %v912_v40, %v918_v50 }
 0xde3   :  { %v982_v23 = vpop.permute.xlu0 %981 }
 0xde4   :  { %v923_v46 = vmul.f32 1.442695, %v920_v53  ;;  %2493 = vmatpush3.bf16.msra.mxu0 %v982_v23  ;;  %2693 = vpow2.f32 %v921_v52  ;;  %v2248_v52 = vld [vmem:[%s3450_s3 + $0xd] ss:$0 sm:$0xff] }
 0xde5   :  { %2494 = vmatprep.subr.bf16.mxu0 %v2773_v15  ;;  %v984_v21 = vpop.permute.xlu1 %983 }
 0xde6   :  { %2695 = vpow2.f32 %v923_v46 }
 0xde7   :  { %v986_v27 = vpop.permute.xlu0 %985 }
 0xde8   :  { %2495 = vmatpush3.bf16.msra.mxu0 %v984_v21 }
 0xde9   :  { %2496 = vmatprep.subr.bf16.mxu0 %v2773_v15  ;;  %v988_v48 = vpop.permute.xlu1 %987 }
 0xdec   :  { %2497 = vmatpush3.bf16.msra.mxu0 %v986_v27  ;;  %v2655_v27 = vld [vmem:[%s3449_s2 + $0xa0] sm:$0xff]  }
 0xded   :  { %2498 = vmatprep.subr.bf16.mxu0 %v2773_v15 }
 0xdee   :  { %v2694_v25 = vpop.eup %2693 }
 0xdf0   :  { %v2696_v54 = vpop.eup %2695  ;;  %2499 = vmatpush3.bf16.msra.mxu0 %v988_v48  ;;  %v2657_v48 = vld [vmem:[%s3449_s2 + $0xb0] sm:$0xff]  }
 0xdf1   :  { %v925_v55 = vpack.c.bf16 %v2696_v54, %v2694_v25  ;;  %2520 = vmatprep.subr.bf16.mxu0 %v2773_v15 }
 0xdf3   :  { %2489 = vmatmul.mubr.msk.bf16.vlgmr.msra.gmra.mrb[12].mxu1 %vm272_vm2, %v925_v55  ;;  %v2659_v55 = vld [vmem:[%s3449_s2 + $0xc0] sm:$0xff]  }
 0xdf4   :  { %2508 = vmatprep.mubr.msk.bf16.mxu1 %vm2774_vm1, %v2773_v15  ;;  %2505 = vmatpush3.bf16.msra.mxu1 %v2651_v56  ;;  %v2660_v56 = vld [vmem:[%s3449_s2 + $0xc8] sm:$0xff]  }
 0xdf5   :  { %2506 = vmatprep.subr.bf16.mxu1 %v2773_v15 }
 0xdf8   :  { %2507 = vmatpush3.bf16.msra.mxu1 %v2652_v6 }
 0xdf9   :  { %2512 = vmatprep.subr.bf16.mxu1 %v2773_v15 }
 0xec6   :  { %v963_v57 = vpop.f32.mrb[12].mxu1 }
 0xec7   :  { %v970_v58 = vmax.f32 %v963_v57, 1e-20  ;;  %v2490_v59 = vpop.f32.mrb[13].mxu1  ;;  %v2661_v57 = vld [vmem:[%s3449_s2 + $0xd0] sm:$0xff]  }
 0xec8   :  { %v966_v60 = vpop.f32.mrb[14].mxu1  ;;  %v2249_v59 = vld [vmem:[%s3450_s3 + $0xe] ss:$0 sm:$0xff] }
 0xec9   :  { %2697 = vrcp.f32 %v970_v58  ;;  %v971_v61 = vmax.f32 %v966_v60, 1e-20  ;;  %v2491_v62 = vpop.f32.mrb[15].mxu1  ;;  %v2662_v58 = vld [vmem:[%s3449_s2 + $0xd8] sm:$0xff]  }
 0xecb   :  { %2699 = vrcp.f32 %v971_v61 }
 0xed3   :  { %v2698_v0 = vpop.eup %2697 }
 0xed4   :  { %v974_v2 = vmul.f32 %v2698_v0, %v2694_v25  ;;  %v2656_v25 = vld [vmem:[%s3449_s2 + $0xa8] sm:$0xff]  }
 0xed5   :  { %v2700_v1 = vpop.eup %2699 }
 0xed6   :  { %v975_v4 = vmul.f32 %v2700_v1, %v2696_v54  ;;  %v2658_v54 = vld [vmem:[%s3449_s2 + $0xb8] sm:$0xff]  }
 0xed8   :  { %v976_v5 = vpack.c.bf16 %v975_v4, %v974_v2 }
 0xeda   :  { %2501 = vmatmul.mubr.msk.bf16.vlgmr.msra.gmra.mrb[24].mxu0 %vm272_vm2, %v976_v5 }
 0xedb   :  { %2536 = vmatprep.mubr.msk.bf16.mxu0 %vm2774_vm1, %v2773_v15  ;;  %2521 = vmatpush3.bf16.msra.mxu0 %v2655_v27 }
 0xedc   :  { %2522 = vmatprep.subr.bf16.mxu0 %v2773_v15 }
 0xedf   :  { %2523 = vmatpush3.bf16.msra.mxu0 %v2656_v25 }
 0xee0   :  { %2524 = vmatprep.subr.bf16.mxu0 %v2773_v15 }
 0xee3   :  { %2525 = vmatpush3.bf16.msra.mxu0 %v2657_v48 }
 0xee4   :  { %2526 = vmatprep.subr.bf16.mxu0 %v2773_v15 }
 0xee7   :  { %2527 = vmatpush3.bf16.msra.mxu0 %v2658_v54  ;;  %v2262_v54 = vld [vmem:[%s3450_s3 + $0x10] ss:$0 sm:$0xff] }
 0xee8   :  { %2528 = vmatprep.subr.bf16.mxu0 %v2773_v15 }
 0xeeb   :  { %2529 = vmatpush3.bf16.msra.mxu0 %v2659_v55 }
 0xeec   :  { %2530 = vmatprep.subr.bf16.mxu0 %v2773_v15 }
 0xeef   :  { %2531 = vmatpush3.bf16.msra.mxu0 %v2660_v56 }
 0xef0   :  { %2532 = vmatprep.subr.bf16.mxu0 %v2773_v15 }
 0xef3   :  { %2533 = vmatpush3.bf16.msra.mxu0 %v2661_v57 }
 0xef4   :  { %2534 = vmatprep.subr.bf16.mxu0 %v2773_v15 }
 0xef7   :  { %2535 = vmatpush3.bf16.msra.mxu0 %v2662_v58 }
 0xef8   :  { %2572 = vmatprep.subr.bf16.mxu0 %v2773_v15 }
 0xfad   :  { %v1030_v9 = vpop.f32.mrb[24].mxu0 }
 0xfae   :  { %v2502_v14 = vpop.f32.mrb[25].mxu0 }
 0xfaf   :  { %v1033_v16 = vpop.f32.mrb[26].mxu0 }
 0xfb0   :  { %v1037_v17 = vpack.c.bf16 %v1033_v16, %v1030_v9  ;;  %v2503_v18 = vpop.f32.mrb[27].mxu0 }
 0xfb2   :  { %2509 = vmatmul.mubr.msk.bf16.vlgmr.msra.gmra.mrb[16].mxu1 %vm41_vm0, %v1037_v17 }
 0xfb3   :  { %2516 = vmatprep.mubr.msk.bf16.mxu1 %vm2774_vm1, %v2773_v15 }
0x1085   :  { %v1096_v19 = vpop.f32.mrb[16].mxu1 }
0x1086   :  { %v1097_v22 = vadd.f32 %v2243_v20, %v1096_v19  ;;  %v2510_v24 = vpop.f32.mrb[17].mxu1 }
0x1087   :  { %v1099_v35 = vpop.f32.mrb[18].mxu1 }
0x1088   :  { %v1100_v36 = vadd.f32 %v2243_v20, %v1099_v35  ;;  %v2511_v26 = vpop.f32.mrb[19].mxu1  ;;  %v1103_v28 = vadd.f32 %v1097_v22, %v3100_v7 }
0x108a   :  { %v1107_v29 = vsel %vm41_vm0, %v1103_v28, 0.0  ;;  %v1104_v10 = vadd.f32 %v1100_v36, %v3102_v8  ;;  %v2653_v8 = vld [vmem:[%s3449_s2 + $0x90] sm:$0xff]  }
0x108b   :  { %1108 = vadd.xlane.f32.xlu0 %v1107_v29  ;;  %2513 = vmatpush3.bf16.msra.mxu1 %v2653_v8 }
0x108c   :  { %v1110_v38 = vsel %vm41_vm0, %v1104_v10, 0.0  ;;  %2514 = vmatprep.subr.bf16.mxu1 %v2773_v15 }
0x108d   :  { %1111 = vadd.xlane.f32.xlu1 %v1110_v38 }
0x108f   :  { %2515 = vmatpush3.bf16.msra.mxu1 %v2654_v37 }
0x1090   :  { %2540 = vmatprep.subr.bf16.mxu1 %v2773_v15 }
0x1118   :  { %v1109_v47 = vpop.xlane.xlu0 %1108 }
0x1119   :  { %v1113_v30 = vmul.f32 0.03125, %v1109_v47  ;;  %v2253_v47 = vld [vmem:[%s3450_s3 + $0xf] ss:$0 sm:$0xff] }
0x111a   :  { %v1112_v43 = vpop.xlane.xlu1 %1111 }
0x111b   :  { %v1115_v51 = vsub.f32 %v1103_v28, %v1113_v30  ;;  %v1114_v31 = vmul.f32 0.03125, %v1112_v43 }
0x111d   :  { %v1116_v32 = vsub.f32 %v1104_v10, %v1114_v31  ;;  %v1117_v33 = vmul.f32 %v1115_v51, %v1115_v51 }
0x111f   :  { %v1119_v34 = vsel %vm41_vm0, %v1117_v33, 0.0  ;;  %v1118_v11 = vmul.f32 %v1116_v32, %v1116_v32 }
0x1120   :  { %1120 = vadd.xlane.f32.xlu0 %v1119_v34 }
0x1121   :  { %v1122_v7 = vsel %vm41_vm0, %v1118_v11, 0.0 }
0x1124   :  { %1123 = vadd.xlane.f32.xlu0 %v1122_v7 }
0x11ad   :  { %v1121_v12 = vpop.xlane.xlu0 %1120 }
0x11ae   :  { %v1125_v39 = vmul.f32 0.03125, %v1121_v12 }
0x11b0   :  { %v1127_v13 = vadd.f32 1e-12, %v1125_v39 }
0x11b1   :  { %v1124_v40 = vpop.xlane.xlu0 %1123 }
0x11b2   :  { %2701 = vrsqrt.f32 %v1127_v13  ;;  %v1126_v41 = vmul.f32 0.03125, %v1124_v40 }
0x11b4   :  { %v1128_v42 = vadd.f32 1e-12, %v1126_v41 }
0x11b6   :  { %2703 = vrsqrt.f32 %v1128_v42 }
0x11bc   :  { %v2702_v44 = vpop.eup %2701 }
0x11bd   :  { %v1131_v45 = vmul.f32 %v2702_v44, %v1115_v51 }
0x11bf   :  { %v1137_v49 = vmul.f32 %v2247_v63, %v1131_v45 }
0x11c0   :  { %v2704_v3 = vpop.eup %2703 }
0x11c1   :  { %v1132_v50 = vmul.f32 %v2704_v3, %v1116_v32  ;;  %v3187_v23 = vadd.f32 %v2248_v52, %v1137_v49  ;;  %v2663_v3 = vld [vmem:[%s3449_s2 + $0xe0] sm:$0xff]   ;;  %v2664_v49 = vld [vmem:[%s3449_s2 + $0xe8] sm:$0xff]  }
0x11c3   :  { %v1138_v53 = vmul.f32 %v2247_v63, %v1132_v50  ;;  %v3253_v50 = vld [vmem:[%s3449_s2 + $0xf0] sm:$0xff]  }
0x11c5   :  { %v3189_v46 = vadd.f32 %v2248_v52, %v1138_v53  ;;  %v3260_v52 = vld [vmem:[%s3449_s2 + $0xf8] sm:$0xff]  }
0x11c7   :  { %v1145_v21 = vpack.c.bf16 %v3189_v46, %v3187_v23 }
0x11c9   :  { %2517 = vmatmul.mubr.msk.bf16.vlgmr.msra.gmra.mrb[20].mxu1 %vm41_vm0, %v1145_v21 }
0x11ca   :  { %2544 = vmatprep.mubr.msk.bf16.mxu1 %vm2774_vm1, %v2773_v15  ;;  %2541 = vmatpush3.bf16.msra.mxu1 %v2663_v3 }
0x11cb   :  { %2542 = vmatprep.subr.bf16.mxu1 %v2773_v15 }
0x11ce   :  { %2543 = vmatpush3.bf16.msra.mxu1 %v2664_v49 }
0x11cf   :  { %2548 = vmatprep.subr.bf16.mxu1 %v2773_v15 }
0x129c   :  { %v1204_v60 = vpop.f32.mrb[20].mxu1 }
0x129d   :  { %v1205_v61 = vadd.f32 %v2249_v59, %v1204_v60  ;;  %v2518_v62 = vpop.f32.mrb[21].mxu1 }
0x129e   :  { %v1207_v0 = vpop.f32.mrb[22].mxu1 }
0x129f   :  { %v1211_v1 = vmul.f32 %v1205_v61, %v1205_v61  ;;  %v1208_v2 = vadd.f32 %v2249_v59, %v1207_v0  ;;  %v2519_v4 = vpop.f32.mrb[23].mxu1  ;;  %v2263_v59 = vld [vmem:[%s3450_s3 + $0x11] ss:$0 sm:$0xff] }
0x12a1   :  { %v1213_v5 = vmul.f32 %v1211_v1, %v1205_v61  ;;  %v1212_v6 = vmul.f32 %v1208_v2, %v1208_v2  ;;  %v2778_v1 = vmov 0  }
0x12a3   :  { %v1215_v9 = vmul.f32 0.044715, %v1213_v5  ;;  %v1214_v14 = vmul.f32 %v1212_v6, %v1208_v2  ;;  %v1382_v5 = vld [vmem:[%s3450_s3 + $0x17] sm:$0x1]  ;;  %v2264_v6 = vld [vmem:[%s3450_s3 + $0x12] ss:$0 sm:$0xff] }
0x12a5   :  { %v1217_v16 = vadd.f32 %v1215_v9, %v1205_v61  ;;  %v1216_v17 = vmul.f32 0.044715, %v1214_v14  ;;  %v1383_v9 = vsub.f32 1.0, %v1382_v5 }
0x12a7   :  { %v1219_v18 = vmul.f32 0.7978846, %v1217_v16  ;;  %v1218_v20 = vadd.f32 %v1216_v17, %v1208_v2 }
0x12a9   :  { %2705 = vtanh.f32 %v1219_v18  ;;  %v1220_v19 = vmul.f32 0.7978846, %v1218_v20 }
0x12ab   :  { %2707 = vtanh.f32 %v1220_v19 }
0x12b3   :  { %v2706_v22 = vpop.eup %2705 }
0x12b4   :  { %v1223_v24 = vadd.f32 1.0, %v2706_v22 }
0x12b5   :  { %v2708_v35 = vpop.eup %2707 }
0x12b6   :  { %v1225_v36 = vmul.f32 0.5, %v1223_v24  ;;  %v1224_v26 = vadd.f32 1.0, %v2708_v35 }
0x12b8   :  { %v1226_v28 = vmul.f32 0.5, %v1224_v26  ;;  %v1227_v29 = vmul.f32 %v1225_v36, %v1205_v61 }
0x12ba   :  { %v1228_v10 = vmul.f32 %v1226_v28, %v1208_v2  ;;  %v1464_v2 = vlaneseq }
0x12bc   :  { %v1229_v38 = vpack.c.bf16 %v1228_v10, %v1227_v29  ;;  %v1465_v4 = vshrl.u32 %v1464_v2, 7 }
0x12be   :  { %2537 = vmatmul.mubr.bf16.vlgmr.msra.gmra.mrb[28].mxu0 %v1229_v38  ;;  %v1466_v14 = vsub.s32 0, %v1465_v4 }
0x12bf   :  { %2576 = vmatprep.mubr.msk.bf16.mxu0 %vm2774_vm1, %v2773_v15  ;;  %2573 = vmatpush3.bf16.msra.mxu0 %v3253_v50 }
0x12c0   :  { %2574 = vmatprep.subr.bf16.mxu0 %v2773_v15  ;;  %v1467_v19 = vrot.slane %v1382_v5, %v1466_v14  ;;  %v1472_v22 = vrot.slane %v1383_v9, %v1466_v14 }
0x12c3   :  { %2575 = vmatpush3.bf16.msra.mxu0 %v3260_v52 }
0x12c4   :  { %2588 = vmatprep.subr.bf16.mxu0 %v2773_v15 }
0x1391   :  { %v1333_v30 = vpop.f32.mrb[28].mxu0 }
0x1392   :  { %v1334_v43 = vadd.f32 %v2253_v47, %v1333_v30  ;;  %v2538_v51 = vpop.f32.mrb[29].mxu0 }
0x1393   :  { %v1336_v31 = vpop.f32.mrb[30].mxu0 }
0x1394   :  { %v1337_v32 = vadd.f32 %v2253_v47, %v1336_v31  ;;  %v2539_v33 = vpop.f32.mrb[31].mxu0  ;;  %v1340_v34 = vadd.f32 %v1334_v43, %v3187_v23 }
0x1396   :  { %v1344_v11 = vsel %vm41_vm0, %v1340_v34, 0.0  ;;  %v1341_v7 = vadd.f32 %v1337_v32, %v3189_v46 }
0x1397   :  { %1345 = vadd.xlane.f32.xlu0 %v1344_v11 }
0x1398   :  { %v1347_v8 = vsel %vm41_vm0, %v1341_v7, 0.0 }
0x1399   :  { %1348 = vadd.xlane.f32.xlu1 %v1347_v8 }
0x1424   :  { %v1346_v37 = vpop.xlane.xlu0 %1345 }
0x1425   :  { %v1350_v12 = vmul.f32 0.03125, %v1346_v37 }
0x1426   :  { %v1349_v39 = vpop.xlane.xlu1 %1348 }
0x1427   :  { %v1352_v13 = vsub.f32 %v1340_v34, %v1350_v12  ;;  %v1351_v40 = vmul.f32 0.03125, %v1349_v39 }
0x1429   :  { %v1353_v41 = vsub.f32 %v1341_v7, %v1351_v40  ;;  %v1354_v42 = vmul.f32 %v1352_v13, %v1352_v13 }
0x142b   :  { %v1356_v44 = vsel %vm41_vm0, %v1354_v42, 0.0  ;;  %v1355_v45 = vmul.f32 %v1353_v41, %v1353_v41 }
0x142c   :  { %1357 = vadd.xlane.f32.xlu0 %v1356_v44 }
0x142d   :  { %v1359_v63 = vsel %vm41_vm0, %v1355_v45, 0.0 }
0x142e   :  { %1360 = vadd.xlane.f32.xlu1 %v1359_v63 }
0x14b9   :  { %v1358_v53 = vpop.xlane.xlu0 %1357 }
0x14ba   :  { %v1362_v23 = vmul.f32 0.03125, %v1358_v53 }
0x14bb   :  { %v1361_v46 = vpop.xlane.xlu1 %1360 }
0x14bc   :  { %v1364_v21 = vadd.f32 1e-12, %v1362_v23  ;;  %v1363_v27 = vmul.f32 0.03125, %v1361_v46 }
0x14be   :  { %2709 = vrsqrt.f32 %v1364_v21  ;;  %v1365_v25 = vadd.f32 1e-12, %v1363_v27 }
0x14c0   :  { %2711 = vrsqrt.f32 %v1365_v25  ;;  %v3300_v25 = vld [vmem:[%s3450_s3 + $0x14] ss:$0 sm:$0xff] }
0x14c8   :  { %v2710_v48 = vpop.eup %2709 }
0x14c9   :  { %v1368_v55 = vmul.f32 %v2710_v48, %v1352_v13 }
0x14ca   :  { %v2712_v56 = vpop.eup %2711 }
0x14cb   :  { %v1374_v57 = vmul.f32 %v2262_v54, %v1368_v55  ;;  %v1369_v58 = vmul.f32 %v2712_v56, %v1353_v41 }
0x14cd   :  { %v1375_v60 = vmul.f32 %v2262_v54, %v1369_v58  ;;  %v1380_v61 = vadd.f32 %v2263_v59, %v1374_v57 }
0x14cf   :  { %v1381_v62 = vadd.f32 %v2263_v59, %v1375_v60 }
0x14d1   :  { %v1387_v0 = vpack.c.bf16 %v1381_v62, %v1380_v61 }
0x14d3   :  { %2545 = vmatmul.mubr.msk.bf16.vlgmr.msra.gmra.mrb[24].mxu1 %vm41_vm0, %v1387_v0 }
0x14d4   :  { %2549 = vmatpush3.bf16.msra.mxu1 %v3253_v50  ;;  %2552 = vmatprep.mubr.msk.bf16.mxu1 %vm2774_vm1, %v2773_v15 }
0x14d5   :  { %2550 = vmatprep.subr.bf16.mxu1 %v2773_v15 }
0x14d8   :  { %2551 = vmatpush3.bf16.msra.mxu1 %v3260_v52 }
0x14d9   :  { %2556 = vmatprep.subr.bf16.mxu1 %v2773_v15 }
0x14db   :  { %2553 = vmatmul.mubr.bf16.vlgmr.msra.gmra.mrb[28].mxu1 %v2778_v1 }
0x14dc   :  { %2557 = vmatpush3.bf16.msra.mxu1 %v3253_v50  ;;  %2560 = vmatprep.mubr.msk.bf16.mxu1 %vm2774_vm1, %v2773_v15 }
0x14dd   :  { %2558 = vmatprep.subr.bf16.mxu1 %v2773_v15 }
0x14e0   :  { %2559 = vmatpush3.bf16.msra.mxu1 %v3260_v52 }
0x14e1   :  { %2564 = vmatprep.subr.bf16.mxu1 %v2773_v15 }
0x15a6   :  { %v1446_v16 = vpop.f32.mrb[24].mxu1 }
0x15a7   :  { %v1447_v17 = vadd.f32 %v2264_v6, %v1446_v16  ;;  %v2546_v18 = vpop.f32.mrb[25].mxu1  ;;  %v3318_v16 = vld [vmem:[%s3450_s3 + $0x15] ss:$0 sm:$0xff] }
0x15a8   :  { %v1449_v20 = vpop.f32.mrb[26].mxu1  ;;  %v3323_v18 = vld [vmem:[%s3450_s3 + $0x16] ss:$0 sm:$0xff] }
0x15a9   :  { %v1450_v24 = vadd.f32 %v2264_v6, %v1449_v20  ;;  %v2547_v35 = vpop.f32.mrb[27].mxu1  ;;  %v1459_v36 = vrot.slane %v1447_v17, 7  ;;  %v1475_v26 = vrot.slane %v1447_v17, 1  ;;  %v1478_v28 = vrot.slane %v1447_v17, 6 }
0x15aa   :  { %v1486_v29 = vrot.slane %v1447_v17, 2  ;;  %v1491_v10 = vrot.slane %v1447_v17, 5  ;;  %v1499_v38 = vrot.slane %v1447_v17, 3  ;;  %v1504_v47 = vrot.slane %v1447_v17, 4 }
0x15ab   :  { %v1454_v30 = vrot.slane %v1450_v24, 7  ;;  %v1461_v43 = vrot.slane %v1450_v24, 6  ;;  %v1477_v51 = vsel %vm1456_vm3, %v1475_v26, %v1450_v24  ;;  %v1480_v31 = vrot.slane %v1450_v24, 5 }
0x15ac   :  { %v1483_v32 = vmul.f32 %v1477_v51, %v1467_v19  ;;  %v1488_v33 = vrot.slane %v1450_v24, 1  ;;  %v1493_v34 = vrot.slane %v1450_v24, 4  ;;  %v1501_v11 = vrot.slane %v1450_v24, 2 }
0x15ad   :  { %v1457_v7 = vsel %vm1456_vm3, %v1447_v17, %v1454_v30  ;;  %v1463_v8 = vsel %vm1456_vm3, %v1459_v36, %v1461_v43  ;;  %v1482_v37 = vsel %vm1456_vm3, %v1478_v28, %v1480_v31  ;;  %v1506_v12 = vrot.slane %v1450_v24, 3 }
0x15ae   :  { %v1468_v39 = vmul.f32 %v1467_v19, %v1457_v7  ;;  %v1473_v13 = vmul.f32 %v1472_v22, %v1463_v8  ;;  %v1577_v40 = vpop.f32.mrb[28].mxu1  ;;  %v1484_v41 = vmul.f32 %v1482_v37, %v1472_v22  ;;  %v1490_v42 = vsel %vm1456_vm3, %v1486_v29, %v1488_v33 }
0x15af   :  { %v2554_v44 = vpop.f32.mrb[29].mxu1  ;;  %v1495_v45 = vsel %vm1456_vm3, %v1491_v10, %v1493_v34  ;;  %v1496_v63 = vmul.f32 %v1490_v42, %v1467_v19  ;;  %v1503_v3 = vsel %vm1456_vm3, %v1499_v38, %v1501_v11  ;;  %v1508_v49 = vsel %vm1456_vm3, %v1504_v47, %v1506_v12 }
0x15b0   :  { %v1474_v53 = vadd.f32 %v1473_v13, %v1468_v39  ;;  %v1580_v23 = vpop.f32.mrb[30].mxu1  ;;  %v1485_v46 = vadd.f32 %v1484_v41, %v1483_v32  ;;  %v1497_v21 = vmul.f32 %v1495_v45, %v1472_v22  ;;  %v1509_v27 = vmul.f32 %v1503_v3, %v1467_v19 }
0x15b1   :  { %v2555_v48 = vpop.f32.mrb[31].mxu1  ;;  %v1510_v54 = vmul.f32 %v1508_v49, %v1472_v22  ;;  %v1512_v55 = vmul.f32 %v1508_v49, %v1467_v19  ;;  %v1513_v56 = vmul.f32 %v1503_v3, %v1472_v22  ;;  %v1515_v57 = vmul.f32 %v1495_v45, %v1467_v19 }
0x15b2   :  { %v1583_v58 = vadd.f32 %v1577_v40, %v1474_v53  ;;  %v3302_v59 = vadd.f32 %v1497_v21, %v1496_v63  ;;  %v1516_v60 = vmul.f32 %v1490_v42, %v1472_v22  ;;  %v1518_v61 = vmul.f32 %v1482_v37, %v1467_v19 }
0x15b3   :  { %v3304_v62 = vadd.f32 %v1510_v54, %v1509_v27  ;;  %v3306_v0 = vadd.f32 %v1513_v56, %v1512_v55  ;;  %v1519_v1 = vmul.f32 %v1477_v51, %v1472_v22  ;;  %v1521_v2 = vmul.f32 %v1467_v19, %v1463_v8 }
0x15b4   :  { %v1588_v4 = vmul.f32 %v3300_v25, %v1583_v58  ;;  %v3309_v5 = vadd.f32 %v1516_v60, %v1515_v57  ;;  %v1522_v6 = vmul.f32 %v1472_v22, %v1457_v7 }
0x15b5   :  { %v3311_v9 = vadd.f32 %v1519_v1, %v1518_v61 }
0x15b6   :  { %2713 = vtanh.f32 %v1588_v4  ;;  %v3313_v14 = vadd.f32 %v1522_v6, %v1521_v2 }
0x15c0   :  { %v2714_v17 = vpop.eup %2713 }
0x15c1   :  { %v1594_v20 = vmul.f32 %v2714_v17, %v3318_v16 }
0x15c3   :  { %v1599_v19 = vadd.f32 %v3323_v18, %v1594_v20 }
0x15c5   :  { %1602 = vrot.lane.b32.xlu0 %v1599_v19, %s2777_s1  ;;  %v1600_v35 = vmul.f32 0.0, %v1599_v19 }
0x1637   :  { %v1603_v22 = vpop.permute.xlu0 %1602 }
0x1638   :  { %v1605_v24 = vmul.f32 %v1603_v22, %v1599_v19 }
0x163a   :  { %1607 = vrot.lane.b32.xlu1 %v1605_v24, %s2775_s26 }
0x16ac   :  { %v1608_v36 = vpop.permute.xlu1 %1607 }
0x16ad   :  { %v1610_v26 = vadd.f32 %v1608_v36, %v1600_v35 }
0x16af   :  { %2715 = vtanh.f32 %v1610_v26 }
0x16b9   :  { %v2716_v28 = vpop.eup %2715 }
0x16ba   :  { %1613 = vrot.lane.b32.xlu1 %v2716_v28, %s2777_s1 }
0x172c   :  { %v1614_v29 = vpop.permute.xlu1 %1613 }
0x172d   :  { %v1616_v10 = vmul.f32 %v1614_v29, %v1599_v19 }
0x172f   :  { %v1617_v38 = vpack.c.bf16 %v1616_v10, %v1616_v10 }
0x1731   :  { %1619 = vrot.lane.b32.xlu1 %v1617_v38, %s2775_s26 }
0x17a3   :  { %v1620_v47 = vpop.permute.xlu1 %1619 }
0x17a4   :  { %2561 = vmatmul.mubr.msk.bf16.vlgmr.msra.gmra.mrb[32].mxu1 %vm41_vm0, %v1620_v47 }
0x17a5   :  { %2565 = vmatpush3.bf16.msra.mxu1 %v3253_v50  ;;  %2568 = vmatprep.mubr.msk.bf16.mxu1 %vm2774_vm1, %v2773_v15 }
0x17a6   :  { %2566 = vmatprep.subr.bf16.mxu1 %v2773_v15 }
0x17a9   :  { %2567 = vmatpush3.bf16.msra.mxu1 %v3260_v52 }
0x17aa   :  { %2580 = vmatprep.subr.bf16.mxu1 %v2773_v15 }
0x1877   :  { %v1658_v30 = vpop.f32.mrb[32].mxu1 }
0x1878   :  { %v1664_v43 = vadd.f32 %v1658_v30, %v1485_v46  ;;  %v2562_v51 = vpop.f32.mrb[33].mxu1 }
0x1879   :  { %v1661_v31 = vpop.f32.mrb[34].mxu1 }
0x187a   :  { %v1665_v32 = vmul.f32 %v3300_v25, %v1664_v43  ;;  %v2563_v33 = vpop.f32.mrb[35].mxu1 }
0x187c   :  { %2717 = vtanh.f32 %v1665_v32 }
0x1886   :  { %v2718_v34 = vpop.eup %2717 }
0x1887   :  { %v1667_v11 = vmul.f32 %v2718_v34, %v3318_v16 }
0x1889   :  { %v1668_v7 = vadd.f32 %v3323_v18, %v1667_v11 }
0x188b   :  { %1671 = vrot.lane.b32.xlu0 %v1668_v7, %s2777_s1  ;;  %v1669_v12 = vmul.f32 %v1668_v7, %v1610_v26 }
0x18fd   :  { %v1672_v8 = vpop.permute.xlu0 %1671 }
0x18fe   :  { %v1674_v37 = vmul.f32 %v1672_v8, %v1668_v7 }
0x1900   :  { %1676 = vrot.lane.b32.xlu1 %v1674_v37, %s2775_s26 }
0x1972   :  { %v1677_v39 = vpop.permute.xlu1 %1676 }
0x1973   :  { %v1679_v13 = vadd.f32 %v1677_v39, %v1669_v12 }
0x1975   :  { %2719 = vtanh.f32 %v1679_v13 }
0x197f   :  { %v2720_v40 = vpop.eup %2719 }
0x1980   :  { %1682 = vrot.lane.b32.xlu0 %v2720_v40, %s2777_s1 }
0x19f2   :  { %v1683_v41 = vpop.permute.xlu0 %1682 }
0x19f3   :  { %v1685_v42 = vmul.f32 %v1683_v41, %v1668_v7 }
0x19f5   :  { %v1686_v44 = vpack.c.bf16 %v1685_v42, %v1685_v42 }
0x19f7   :  { %1688 = vrot.lane.b32.xlu1 %v1686_v44, %s2775_s26 }
0x1a69   :  { %v1689_v45 = vpop.permute.xlu1 %1688 }
0x1a6a   :  { %2569 = vmatmul.mubr.msk.bf16.vlgmr.msra.gmra.mrb[36].mxu1 %vm41_vm0, %v1689_v45 }
0x1a6b   :  { %2581 = vmatpush3.bf16.msra.mxu1 %v3253_v50  ;;  %2584 = vmatprep.mubr.msk.bf16.mxu1 %vm2774_vm1, %v2773_v15 }
0x1a6c   :  { %2582 = vmatprep.subr.bf16.mxu1 %v2773_v15 }
0x1a6f   :  { %2583 = vmatpush3.bf16.msra.mxu1 %v3260_v52 }
0x1a70   :  { %2596 = vmatprep.subr.bf16.mxu1 %v2773_v15 }
0x1b3d   :  { %v1727_v63 = vpop.f32.mrb[36].mxu1 }
0x1b3e   :  { %v1733_v3 = vadd.f32 %v1727_v63, %v3302_v59  ;;  %v2570_v49 = vpop.f32.mrb[37].mxu1 }
0x1b3f   :  { %v1730_v53 = vpop.f32.mrb[38].mxu1 }
0x1b40   :  { %v1734_v23 = vmul.f32 %v3300_v25, %v1733_v3  ;;  %v2571_v46 = vpop.f32.mrb[39].mxu1 }
0x1b42   :  { %2721 = vtanh.f32 %v1734_v23 }
0x1b4c   :  { %v2722_v21 = vpop.eup %2721 }
0x1b4d   :  { %v1736_v27 = vmul.f32 %v2722_v21, %v3318_v16 }
0x1b4f   :  { %v1737_v48 = vadd.f32 %v3323_v18, %v1736_v27 }
0x1b51   :  { %1740 = vrot.lane.b32.xlu0 %v1737_v48, %s2777_s1  ;;  %v1738_v56 = vmul.f32 %v1737_v48, %v1679_v13 }
0x1bc3   :  { %v1741_v54 = vpop.permute.xlu0 %1740 }
0x1bc4   :  { %v1743_v55 = vmul.f32 %v1741_v54, %v1737_v48 }
0x1bc6   :  { %1745 = vrot.lane.b32.xlu1 %v1743_v55, %s2775_s26 }
0x1c38   :  { %v1746_v57 = vpop.permute.xlu1 %1745 }
0x1c39   :  { %v1748_v58 = vadd.f32 %v1746_v57, %v1738_v56 }
0x1c3b   :  { %2723 = vtanh.f32 %v1748_v58 }
0x1c45   :  { %v2724_v59 = vpop.eup %2723 }
0x1c46   :  { %1751 = vrot.lane.b32.xlu0 %v2724_v59, %s2777_s1 }
0x1cb8   :  { %v1752_v60 = vpop.permute.xlu0 %1751 }
0x1cb9   :  { %v1754_v61 = vmul.f32 %v1752_v60, %v1737_v48 }
0x1cbb   :  { %v1755_v1 = vpack.c.bf16 %v1754_v61, %v1754_v61 }
0x1cbd   :  { %1757 = vrot.lane.b32.xlu1 %v1755_v1, %s2775_s26 }
0x1d2f   :  { %v1758_v2 = vpop.permute.xlu1 %1757 }
0x1d30   :  { %2577 = vmatmul.mubr.msk.bf16.vlgmr.msra.gmra.mrb[32].mxu0 %vm41_vm0, %v1758_v2 }
0x1d31   :  { %2589 = vmatpush3.bf16.msra.mxu0 %v3253_v50  ;;  %2592 = vmatprep.mubr.msk.bf16.mxu0 %vm2774_vm1, %v2773_v15 }
0x1d32   :  { %2590 = vmatprep.subr.bf16.mxu0 %v2773_v15 }
0x1d35   :  { %2591 = vmatpush3.bf16.msra.mxu0 %v3260_v52 }
0x1d36   :  { %2604 = vmatprep.subr.bf16.mxu0 %v2773_v15 }
0x1e03   :  { %v1796_v4 = vpop.f32.mrb[32].mxu0 }
0x1e04   :  { %v1802_v6 = vadd.f32 %v1796_v4, %v3304_v62  ;;  %v2578_v17 = vpop.f32.mrb[33].mxu0 }
0x1e05   :  { %v1799_v20 = vpop.f32.mrb[34].mxu0 }
0x1e06   :  { %v1803_v19 = vmul.f32 %v3300_v25, %v1802_v6  ;;  %v2579_v22 = vpop.f32.mrb[35].mxu0 }
0x1e08   :  { %2725 = vtanh.f32 %v1803_v19 }
0x1e12   :  { %v2726_v24 = vpop.eup %2725 }
0x1e13   :  { %v1805_v35 = vmul.f32 %v2726_v24, %v3318_v16 }
0x1e15   :  { %v1806_v36 = vadd.f32 %v3323_v18, %v1805_v35 }
0x1e17   :  { %1809 = vrot.lane.b32.xlu0 %v1806_v36, %s2777_s1  ;;  %v1807_v29 = vmul.f32 %v1806_v36, %v1748_v58 }
0x1e89   :  { %v1810_v26 = vpop.permute.xlu0 %1809 }
0x1e8a   :  { %v1812_v28 = vmul.f32 %v1810_v26, %v1806_v36 }
0x1e8c   :  { %1814 = vrot.lane.b32.xlu1 %v1812_v28, %s2775_s26 }
0x1efe   :  { %v1815_v10 = vpop.permute.xlu1 %1814 }
0x1eff   :  { %v1817_v62 = vadd.f32 %v1815_v10, %v1807_v29 }
0x1f01   :  { %2727 = vtanh.f32 %v1817_v62 }
0x1f0b   :  { %v2728_v38 = vpop.eup %2727 }
0x1f0c   :  { %1820 = vrot.lane.b32.xlu0 %v2728_v38, %s2777_s1 }
0x1f7e   :  { %v1821_v47 = vpop.permute.xlu0 %1820 }
0x1f7f   :  { %v1823_v30 = vmul.f32 %v1821_v47, %v1806_v36 }
0x1f81   :  { %v1824_v43 = vpack.c.bf16 %v1823_v30, %v1823_v30 }
0x1f83   :  { %1826 = vrot.lane.b32.xlu1 %v1824_v43, %s2775_s26 }
0x1ff5   :  { %v1827_v51 = vpop.permute.xlu1 %1826 }
0x1ff6   :  { %2585 = vmatmul.mubr.msk.bf16.vlgmr.msra.gmra.mrb[40].mxu1 %vm41_vm0, %v1827_v51 }
0x1ff7   :  { %2597 = vmatpush3.bf16.msra.mxu1 %v3253_v50  ;;  %2600 = vmatprep.mubr.msk.bf16.mxu1 %vm2774_vm1, %v2773_v15 }
0x1ff8   :  { %2598 = vmatprep.subr.bf16.mxu1 %v2773_v15 }
0x1ffb   :  { %2599 = vmatpush3.bf16.msra.mxu1 %v3260_v52 }
0x1ffc   :  { %2612 = vmatprep.subr.bf16.mxu1 %v2773_v15 }
0x20c9   :  { %v1865_v31 = vpop.f32.mrb[40].mxu1 }
0x20ca   :  { %v1871_v32 = vadd.f32 %v1865_v31, %v3306_v0  ;;  %v2586_v33 = vpop.f32.mrb[41].mxu1 }
0x20cb   :  { %v1868_v34 = vpop.f32.mrb[42].mxu1 }
0x20cc   :  { %v1872_v11 = vmul.f32 %v3300_v25, %v1871_v32  ;;  %v2587_v7 = vpop.f32.mrb[43].mxu1 }
0x20ce   :  { %2729 = vtanh.f32 %v1872_v11 }
0x20d8   :  { %v2730_v8 = vpop.eup %2729 }
0x20d9   :  { %v1874_v37 = vmul.f32 %v2730_v8, %v3318_v16 }
0x20db   :  { %v1875_v12 = vadd.f32 %v3323_v18, %v1874_v37 }
0x20dd   :  { %1878 = vrot.lane.b32.xlu0 %v1875_v12, %s2777_s1  ;;  %v1876_v40 = vmul.f32 %v1875_v12, %v1817_v62 }
0x214f   :  { %v1879_v39 = vpop.permute.xlu0 %1878 }
0x2150   :  { %v1881_v13 = vmul.f32 %v1879_v39, %v1875_v12 }
0x2152   :  { %1883 = vrot.lane.b32.xlu1 %v1881_v13, %s2775_s26 }
0x21c4   :  { %v1884_v41 = vpop.permute.xlu1 %1883 }
0x21c5   :  { %v1886_v0 = vadd.f32 %v1884_v41, %v1876_v40 }
0x21c7   :  { %2731 = vtanh.f32 %v1886_v0 }
0x21d1   :  { %v2732_v42 = vpop.eup %2731 }
0x21d2   :  { %1889 = vrot.lane.b32.xlu0 %v2732_v42, %s2777_s1 }
0x2244   :  { %v1890_v44 = vpop.permute.xlu0 %1889 }
0x2245   :  { %v1892_v45 = vmul.f32 %v1890_v44, %v1875_v12  ;;  %v2280_v44 = vld [vmem:[%s3450_s3 + $0x13] ss:$0 sm:$0xff] }
0x2247   :  { %v1893_v63 = vpack.c.bf16 %v1892_v45, %v1892_v45 }
0x2249   :  { %1895 = vrot.lane.b32.xlu1 %v1893_v63, %s2775_s26 }
0x22bb   :  { %v1896_v3 = vpop.permute.xlu1 %1895 }
0x22bc   :  { %2593 = vmatmul.mubr.msk.bf16.vlgmr.msra.gmra.mrb[36].mxu0 %vm41_vm0, %v1896_v3 }
0x22bd   :  { %2605 = vmatpush3.bf16.msra.mxu0 %v3253_v50  ;;  %2608 = vmatprep.mubr.msk.bf16.mxu0 %vm2774_vm1, %v2773_v15 }
0x22be   :  { %2606 = vmatprep.subr.bf16.mxu0 %v2773_v15 }
0x22c1   :  { %2607 = vmatpush3.bf16.msra.mxu0 %v3260_v52 }
0x238f   :  { %v1934_v49 = vpop.f32.mrb[36].mxu0 }
0x2390   :  { %v1940_v53 = vadd.f32 %v1934_v49, %v3309_v5  ;;  %v2594_v23 = vpop.f32.mrb[37].mxu0 }
0x2391   :  { %v1937_v46 = vpop.f32.mrb[38].mxu0 }
0x2392   :  { %v1941_v21 = vmul.f32 %v3300_v25, %v1940_v53  ;;  %v2595_v27 = vpop.f32.mrb[39].mxu0 }
0x2394   :  { %2733 = vtanh.f32 %v1941_v21 }
0x239e   :  { %v2734_v48 = vpop.eup %2733 }
0x239f   :  { %v1943_v54 = vmul.f32 %v2734_v48, %v3318_v16 }
0x23a1   :  { %v1944_v50 = vadd.f32 %v3323_v18, %v1943_v54 }
0x23a3   :  { %1947 = vrot.lane.b32.xlu0 %v1944_v50, %s2777_s1  ;;  %v1945_v52 = vmul.f32 %v1944_v50, %v1886_v0 }
0x2415   :  { %v1948_v55 = vpop.permute.xlu0 %1947 }
0x2416   :  { %v1950_v56 = vmul.f32 %v1948_v55, %v1944_v50 }
0x2418   :  { %1952 = vrot.lane.b32.xlu1 %v1950_v56, %s2775_s26 }
0x248a   :  { %v1953_v57 = vpop.permute.xlu1 %1952 }
0x248b   :  { %v1955_v5 = vadd.f32 %v1953_v57, %v1945_v52 }
0x248d   :  { %2735 = vtanh.f32 %v1955_v5 }
0x2497   :  { %v2736_v58 = vpop.eup %2735 }
0x2498   :  { %1958 = vrot.lane.b32.xlu0 %v2736_v58, %s2777_s1 }
0x250a   :  { %v1959_v59 = vpop.permute.xlu0 %1958 }
0x250b   :  { %v1961_v60 = vmul.f32 %v1959_v59, %v1944_v50 }
0x250d   :  { %v1962_v61 = vpack.c.bf16 %v1961_v60, %v1961_v60 }
0x250f   :  { %1964 = vrot.lane.b32.xlu1 %v1962_v61, %s2775_s26 }
0x2581   :  { %v1965_v1 = vpop.permute.xlu1 %1964 }
0x2582   :  { %2601 = vmatmul.mubr.msk.bf16.vlgmr.msra.gmra.mrb[44].mxu1 %vm41_vm0, %v1965_v1 }
0x2583   :  { %2616 = vmatprep.mubr.msk.bf16.mxu1 %vm2774_vm1, %v2773_v15 }
0x2655   :  { %v2003_v2 = vpop.f32.mrb[44].mxu1 }
0x2656   :  { %v2009_v4 = vadd.f32 %v2003_v2, %v3311_v9  ;;  %v2602_v6 = vpop.f32.mrb[45].mxu1 }
0x2657   :  { %v2006_v17 = vpop.f32.mrb[46].mxu1 }
0x2658   :  { %v2010_v20 = vmul.f32 %v3300_v25, %v2009_v4  ;;  %v2603_v19 = vpop.f32.mrb[47].mxu1 }
0x265a   :  { %2737 = vtanh.f32 %v2010_v20 }
0x2664   :  { %v2738_v22 = vpop.eup %2737 }
0x2665   :  { %v2012_v24 = vmul.f32 %v2738_v22, %v3318_v16 }
0x2667   :  { %v2013_v35 = vadd.f32 %v3323_v18, %v2012_v24 }
0x2669   :  { %2016 = vrot.lane.b32.xlu0 %v2013_v35, %s2777_s1  ;;  %v2014_v28 = vmul.f32 %v2013_v35, %v1955_v5 }
0x26db   :  { %v2017_v36 = vpop.permute.xlu0 %2016 }
0x26dc   :  { %v2019_v26 = vmul.f32 %v2017_v36, %v2013_v35 }
0x26de   :  { %2021 = vrot.lane.b32.xlu1 %v2019_v26, %s2775_s26 }
0x2750   :  { %v2022_v29 = vpop.permute.xlu1 %2021 }
0x2751   :  { %v2024_v9 = vadd.f32 %v2022_v29, %v2014_v28 }
0x2753   :  { %2739 = vtanh.f32 %v2024_v9 }
0x275d   :  { %v2740_v10 = vpop.eup %2739 }
0x275e   :  { %2027 = vrot.lane.b32.xlu0 %v2740_v10, %s2777_s1 }
0x27d0   :  { %v2028_v62 = vpop.permute.xlu0 %2027 }
0x27d1   :  { %v2030_v38 = vmul.f32 %v2028_v62, %v2013_v35 }
0x27d3   :  { %v2031_v47 = vpack.c.bf16 %v2030_v38, %v2030_v38 }
0x27d5   :  { %2033 = vrot.lane.b32.xlu1 %v2031_v47, %s2775_s26 }
0x2847   :  { %v2034_v30 = vpop.permute.xlu1 %2033 }
0x2848   :  { %2609 = vmatmul.mubr.msk.bf16.vlgmr.msra.gmra.mrb[40].mxu0 %vm41_vm0, %v2034_v30 }
0x291b   :  { %v2072_v43 = vpop.f32.mrb[40].mxu0 }
0x291c   :  { %v2078_v51 = vadd.f32 %v2072_v43, %v3313_v14  ;;  %v2610_v31 = vpop.f32.mrb[41].mxu0 }
0x291d   :  { %v2075_v32 = vpop.f32.mrb[42].mxu0 }
0x291e   :  { %v2079_v33 = vmul.f32 %v3300_v25, %v2078_v51  ;;  %v2611_v34 = vpop.f32.mrb[43].mxu0  ;;  %v2667_v25 = vld [vmem:[%s3449_s2 + $0x100] sm:$0xff]  }
0x291f   :  { %2613 = vmatpush3.bf16.msra.mxu1 %v2667_v25 }
0x2920   :  { %2741 = vtanh.f32 %v2079_v33  ;;  %2614 = vmatprep.subr.bf16.mxu1 %v2773_v15 }
0x292a   :  { %v2742_v11 = vpop.eup %2741 }
0x292b   :  { %v2081_v7 = vmul.f32 %v2742_v11, %v3318_v16  ;;  %v2668_v16 = vld [vmem:[%s3449_s2 + $0x108] sm:$0xff]   ;;  %s2779_s2 = smov [#allocation2]  }
0x292c   :  { %2615 = vmatpush3.bf16.msra.mxu1 %v2668_v16  ;;  %s2190_s3 = sshll.u32 %s2779_s2, 4  ;;  %s2191_s3 = int_to_ptr.vmem [resolvable:$true] %s2190_s3 }
0x292d   :  { %v2082_v8 = vadd.f32 %v3323_v18, %v2081_v7  ;;  %p2754_p1 = scmp.lt.s32.totalorder %s2191_s3, %s2191_s3 }
0x292f   :  { %2085 = vrot.lane.b32.xlu0 %v2082_v8, %s2777_s1  ;;  %v2083_v39 = vmul.f32 %v2082_v8, %v2024_v9 }
0x29a1   :  { %v2086_v37 = vpop.permute.xlu0 %2085 }
0x29a2   :  { %v2088_v12 = vmul.f32 %v2086_v37, %v2082_v8 }
0x29a4   :  { %2090 = vrot.lane.b32.xlu1 %v2088_v12, %s2775_s26 }
0x2a16   :  { %v2091_v13 = vpop.permute.xlu1 %2090 }
0x2a17   :  { %v2093_v14 = vadd.f32 %v2091_v13, %v2083_v39 }
0x2a19   :  { %2743 = vtanh.f32 %v2093_v14 }
0x2a23   :  { %v2744_v18 = vpop.eup %2743 }
0x2a24   :  { %2096 = vrot.lane.b32.xlu0 %v2744_v18, %s2777_s1 }
0x2a96   :  { %v2097_v40 = vpop.permute.xlu0 %2096 }
0x2a97   :  { %v2099_v41 = vmul.f32 %v2097_v40, %v2082_v8 }
0x2a99   :  { %v2100_v0 = vpack.c.bf16 %v2099_v41, %v2099_v41 }
0x2a9b   :  { %2111 = vrot.lane.b32.xlu1 %v2100_v0, %s2775_s26  ;;  %s2749_s26 = scalar_lea.vmem %s2191_s3, 32 }
0x2a9c   :  { %p2750_p0 = scmp.ne.s32.totalorder %s2191_s3, %s2749_s26  ;;  %p2755_p2 = scmp.lt.s32.totalorder %s2749_s26, %s2749_s26 }
0x2a9e   :  { %p2756_p3 = por %p2755_p2, %p2754_p1 }
0x2aa0   :  { %p2757_p4 = pnand %p2756_p3, %p2750_p0 }
0x2b0d   :  { %v2112_v42 = vpop.permute.xlu1 %2111 }
0x2b0e   :  { %2617 = vmatmul.mubr.msk.bf16.vlgmr.msra.gmra.mrb[48].mxu1 %vm41_vm0, %v2112_v42 }
0x2be1   :  { %v2162_v45 = vpop.f32.mrb[48].mxu1 }
0x2be2   :  { %v2163_v63 = vadd.f32 %v2280_v44, %v2162_v45  ;;  %v2618_v3 = vpop.f32.mrb[49].mxu1 }
0x2be3   :  { %v2165_v15 = vpop.f32.mrb[50].mxu1 }
0x2be4   :  { %v2168_v49 = vmax.f32 %v2163_v63, 0.0  ;;  %v2619_v53 = vpop.f32.mrb[51].mxu1 }
0x2be6   :  { %v2170_v23 = vsel %vm2169_vm4, %v2168_v49, -inf }
0x2be7   :  { %2171 = vmax.xlane.f32.xlu0 %v2170_v23 }
0x2c74   :  { %v2172_v46 = vpop.xlane.xlu0 %2171 }
0x2c75   :  { %v2173_v21 = vsub.f32 %v2168_v49, %v2172_v46 }
0x2c77   :  { %v2174_v27 = vmul.f32 1.442695, %v2173_v21 }
0x2c79   :  { %2745 = vpow2.f32 %v2174_v27 }
0x2c83   :  { %v2746_v48 = vpop.eup %2745 }
0x2c84   :  { %v2176_v54 = vsel %vm2169_vm4, %v2746_v48, 0.0 }
0x2c85   :  { %2177 = vadd.xlane.f32.xlu1 %v2176_v54 }
0x2d12   :  { %v2178_v50 = vpop.xlane.xlu1 %2177 }
0x2d13   :  { %2747 = vrcp.f32 %v2178_v50 }
0x2d1d   :  { %v2748_v55 = vpop.eup %2747 }
0x2d1e   :  { %v2180_v56 = vmul.f32 %v2748_v55, %v2746_v48 }
0x2d20   :  { %v2182_v52 = vsel %vm2181_vm5, %v2180_v56, 0.0 }
0x2d21   :  { %2183 = vst [vmem:[#allocation2] sm:$0x3] %v2182_v52 }
0x2d22   :  { %2760 = shalt.err (!%p2757_p4)
}
0x2d23   :  { %s2761_s28 = scalar_lea.hbm %s3451_s4, 32 }
0x2d24   :  { %p2762_p5 = scmp.ne.s32.totalorder %s3451_s4, %s2761_s28  ;;  %p2765_p6 = scmp.lt.u32.totalorder %s2761_s28, %s3451_s4 }
0x2d26   :  { %p2767_p7 = pnand %p2765_p6, %p2762_p5 }
0x2d28   :  { %2770 = shalt.err (!%p2767_p7)
}
0x2d29   :  { %2193 = dma.vmem_to_hbm [thread:$0]  %s2191_s3, 32, %s3451_s4, [#allocation3]  }
0x2d2a   :  { %2771 = dma.done.wait [#allocation3], 32  }
0x2d2b   :  { %2772 = vsyncadd [#allocation3], 4294967264 }
0x2d2c   :  { %2197 = vsyncpa [#allocation3], 1 }

</bundles_post_ra>
